<compile_context>
chip_gen: v7x
topology: tpu7x:2x2x1
jax: 0.10.0
libtpu: 0.0.40
codegen_flags: <defaults>
</compile_context>

<pallas_src>
import jax
import jax.numpy as jnp
import numpy as np
from jax import lax
from jax.experimental import pallas as pl
from jax.experimental.pallas import tpu as pltpu

POOL_SIZES = (5, 9, 13)
_CHUNK = 8  # channels (sublanes) processed per inner step


def _neg_value(dtype):
    if jnp.issubdtype(dtype, jnp.floating):
        return jnp.array(-jnp.inf, dtype)
    return jnp.array(jnp.iinfo(dtype).min, dtype)


def _make_spp_kernel(c_block, h, w):
    hw = h * w
    ch = _CHUNK if (c_block % _CHUNK == 0 and c_block >= _CHUNK) else c_block
    n_chunks = c_block // ch

    # Static lane-rotation residues covering relative offsets {+-1, +-2} along
    # W and {+-1, +-2} rows along H on the flattened H*W lane axis.  Both +d
    # and -d residues are included, and validity is re-derived from the rolled
    # coordinates, so the construction is exact regardless of the rotate
    # direction convention and of wrap-around at the flat-axis ends.
    w_shifts = sorted({d % hw for d in (1, 2, -1, -2)} - {0})
    h_shifts = sorted({(d * w) % hw for d in (1, 2, -1, -2)} - {0})

    def kernel(x_ref, hidx_ref, widx_ref, o_ref):
        neg = _neg_value(x_ref.dtype)

        # Per-lane spatial coordinates, broadcast once to the chunk shape
        # (32-bit sublane broadcast) and reused by all three cascade levels.
        hi = jnp.broadcast_to(hidx_ref[...], (ch, hw))
        wi = jnp.broadcast_to(widx_ref[...], (ch, hw))

        def masks_for(shifts, along_w):
            pairs = []
            for r in shifts:
                hr = pltpu.roll(hi, shift=r, axis=1)
                wr = pltpu.roll(wi, shift=r, axis=1)
                dh = hr - hi
                dw = wr - wi
                if along_w:
                    m = (dh == 0) & (dw >= -2) & (dw <= 2)
                else:
                    m = (dw == 0) & (dh >= -2) & (dh <= 2)
                pairs.append((r, m))
            return pairs

        w_pass = masks_for(w_shifts, along_w=True)   # hoisted out of the loop
        h_pass = masks_for(h_shifts, along_w=False)

        def slide5(v, pairs):
            # 5-wide "same" max (ignore-out-of-bounds padding) along one
            # spatial direction, computed on the flattened lane axis.
            out = v
            for r, m in pairs:
                shifted = pltpu.roll(v, shift=r, axis=1)
                out = jnp.maximum(out, jnp.where(m, shifted, neg))
            return out

        def pool5(v):
            return slide5(slide5(v, w_pass), h_pass)

        def process(off):
            xs = x_ref[0, pl.ds(off, ch), :]   # (ch, hw) channel stripe
            p1 = pool5(xs)                     # 5x5
            p2 = pool5(p1)                     # 9x9  (= pool5 ∘ pool5)
            p3 = pool5(p2)                     # 13x13
            o_ref[0, 0, pl.ds(off, ch), :] = xs
            o_ref[0, 1, pl.ds(off, ch), :] = p1
            o_ref[0, 2, pl.ds(off, ch), :] = p2
            o_ref[0, 3, pl.ds(off, ch), :] = p3

        if n_chunks == 1:
            process(0)
        else:
            def body(i, carry):
                process(pl.multiple_of(i * ch, ch))
                return carry
            lax.fori_loop(0, n_chunks, body, 0)

    return kernel


def _vmem_limit_bytes():
    """Generation-aware VMEM limit: ~48 MiB on v7x (64 MiB physical),
    112 MiB on v5e/v6e (128 MiB physical)."""
    phys = 64 * 1024 * 1024
    try:
        info = pltpu.get_tpu_info()
        phys = int(getattr(info, "vmem_capacity_bytes", phys))
    except Exception:
        pass
    return int(max(32 * 1024 * 1024,
                   min(phys - 16 * 1024 * 1024, 112 * 1024 * 1024)))


def _choose_c_block(n, c, hw, itemsize, vmem_limit):
    """Largest channel tile whose exact per-step footprint (double-buffered
    input block + double-buffered 4x output block) fits in the VMEM budget;
    prefers >= 2 channel tiles when N == 1 so both v7x TensorCores get work."""
    if c % 8 != 0 or c <= 8:
        return c
    per_ch = 10 * hw * itemsize              # 2*in + 2*out(=4x in) per channel
    budget = (vmem_limit * 3) // 4           # headroom for compiler scratch
    cands = [d for d in range(8, c + 1, 8) if c % d == 0]
    fits = [d for d in cands if d * per_ch <= budget]
    cb = max(fits) if fits else min(cands)
    if n == 1 and c // cb < 2:
        two_plus = [d for d in (fits if fits else cands) if c // d >= 2]
        if two_plus:
            cb = max(two_plus)
    return cb


def spp(x):
    """SPP forward: cat([x, maxpool5, maxpool9, maxpool13], axis=1) on NCHW."""
    n, c, h, w = x.shape
    hw = h * w
    itemsize = jnp.dtype(x.dtype).itemsize

    # Free layout change only (contiguous-dim merge, no HBM copy).
    x_flat = x.reshape(n, c, hw)

    # Per-lane spatial coordinates on the flattened H*W axis (tiny constants).
    flat = np.arange(hw, dtype=np.int32)
    h_idx = jnp.asarray((flat // w).reshape(1, hw))
    w_idx = jnp.asarray((flat % w).reshape(1, hw))

    vmem_limit = _vmem_limit_bytes()
    cb = _choose_c_block(n, c, hw, itemsize, vmem_limit)
    num_cb = c // cb

    kernel = _make_spp_kernel(cb, h, w)

    cost = pl.CostEstimate(
        flops=48 * n * c * hw,                       # maxes + selects, advisory
        transcendentals=0,
        bytes_accessed=5 * n * c * hw * itemsize,    # 1 read + 4 writes of |x|
    )

    out = pl.pallas_call(
        kernel,
        out_shape=jax.ShapeDtypeStruct((n, 4, c, hw), x.dtype),
        grid_spec=pltpu.PrefetchScalarGridSpec(
            num_scalar_prefetch=0,
            grid=(n, num_cb),
            in_specs=[
                pl.BlockSpec((1, cb, hw), lambda ni, ci: (ni, ci, 0)),
                pl.BlockSpec((1, hw), lambda ni, ci: (0, 0)),
                pl.BlockSpec((1, hw), lambda ni, ci: (0, 0)),
            ],
            out_specs=pl.BlockSpec((1, 4, cb, hw),
                                   lambda ni, ci: (ni, 0, ci, 0)),
        ),
        compiler_params=pltpu.CompilerParams(
            dimension_semantics=("parallel", "parallel"),
            vmem_limit_bytes=vmem_limit,
        ),
        cost_estimate=cost,
    )(x_flat, h_idx, w_idx)

    # (N, 4, C, H*W) -> (N, 4*C, H, W): free reshape, matches torch.cat order
    # ([x, x1, x2, x3] along channels).
    return out.reshape(n, 4 * c, h, w)


def spp_reference(x):
    """Pure-JAX reference matching torch.nn.functional.max_pool2d semantics."""
    if jnp.issubdtype(x.dtype, jnp.floating):
        init = jnp.array(-jnp.inf, x.dtype)
    else:
        init = jnp.array(jnp.iinfo(x.dtype).min, x.dtype)
    outs = [x]
    for k in POOL_SIZES:
        p = k // 2
        outs.append(jax.lax.reduce_window(
            x, init, jax.lax.max,
            window_dimensions=(1, 1, k, k),
            window_strides=(1, 1, 1, 1),
            padding=((0, 0), (0, 0), (p, p), (p, p)),
        ))
    return jnp.concatenate(outs, axis=1)


if __name__ == "__main__":
    key = jax.random.PRNGKey(0)
    x = jax.random.normal(key, (2, 4, 16, 16), dtype=jnp.float32)

    out = jax.block_until_ready(spp(x))
    ref = jax.block_until_ready(spp_reference(x))

    assert out.shape == (2, 16, 16, 16), out.shape
    np.testing.assert_allclose(np.asarray(out), np.asarray(ref), rtol=0, atol=0)

    print("KERNEL_OK")
</pallas_src>

<mosaic_0001>
module attributes {stable_mosaic.version = 11 : i64} {
  func.func @kernel(%arg0: i32, %arg1: i32, %arg2: memref<1x4x256xf32, #tpu.memory_space<vmem>>, %arg3: memref<1x256xi32, #tpu.memory_space<vmem>>, %arg4: memref<1x256xi32, #tpu.memory_space<vmem>>, %arg5: memref<1x4x4x256xf32, #tpu.memory_space<vmem>>) attributes {dimension_semantics = [#tpu.dimension_semantics<parallel>, #tpu.dimension_semantics<parallel>], iteration_bounds = array<i64: 2, 1>, scalar_prefetch = 0 : i64, scratch_operands = 0 : i64, tpu.core_type = #tpu.core_type<tc>, window_params = [{transform_indices = @transform_0, window_bounds = array<i64: 1, 4, 256>}, {pipeline_mode = #tpu.pipeline_mode<synchronous>, transform_indices = @transform_1, window_bounds = array<i64: 1, 256>}, {pipeline_mode = #tpu.pipeline_mode<synchronous>, transform_indices = @transform_2, window_bounds = array<i64: 1, 256>}, {transform_indices = @transform_3, window_bounds = array<i64: 1, 4, 4, 256>}]} {
    %c0 = arith.constant 0 : index
    %c0_0 = arith.constant 0 : index
    %0 = vector.load %arg3[%c0, %c0_0] : memref<1x256xi32, #tpu.memory_space<vmem>>, vector<1x256xi32>
    %1 = vector.shape_cast %0 : vector<1x256xi32> to vector<1x256xi32>
    %2 = vector.broadcast %1 : vector<1x256xi32> to vector<4x256xi32>
    %c0_1 = arith.constant 0 : index
    %c0_2 = arith.constant 0 : index
    %3 = vector.load %arg4[%c0_1, %c0_2] : memref<1x256xi32, #tpu.memory_space<vmem>>, vector<1x256xi32>
    %4 = vector.shape_cast %3 : vector<1x256xi32> to vector<1x256xi32>
    %5 = vector.broadcast %4 : vector<1x256xi32> to vector<4x256xi32>
    %c1_i32 = arith.constant 1 : i32
    %6 = tpu.dynamic_rotate %2 by %c1_i32 dim 1 : vector<4x256xi32>, i32 -> vector<4x256xi32>
    %c1_i32_3 = arith.constant 1 : i32
    %7 = tpu.dynamic_rotate %5 by %c1_i32_3 dim 1 : vector<4x256xi32>, i32 -> vector<4x256xi32>
    %8 = arith.subi %6, %2 : vector<4x256xi32>
    %9 = arith.subi %7, %5 : vector<4x256xi32>
    %c0_i32 = arith.constant 0 : i32
    %10 = vector.broadcast %c0_i32 : i32 to vector<4x256xi32>
    %11 = arith.cmpi eq, %8, %10 : vector<4x256xi32>
    %c-2_i32 = arith.constant -2 : i32
    %12 = vector.broadcast %c-2_i32 : i32 to vector<4x256xi32>
    %13 = arith.cmpi sge, %9, %12 : vector<4x256xi32>
    %14 = arith.andi %11, %13 : vector<4x256xi1>
    %c2_i32 = arith.constant 2 : i32
    %15 = vector.broadcast %c2_i32 : i32 to vector<4x256xi32>
    %16 = arith.cmpi sle, %9, %15 : vector<4x256xi32>
    %17 = arith.andi %14, %16 : vector<4x256xi1>
    %c2_i32_4 = arith.constant 2 : i32
    %18 = tpu.dynamic_rotate %2 by %c2_i32_4 dim 1 : vector<4x256xi32>, i32 -> vector<4x256xi32>
    %c2_i32_5 = arith.constant 2 : i32
    %19 = tpu.dynamic_rotate %5 by %c2_i32_5 dim 1 : vector<4x256xi32>, i32 -> vector<4x256xi32>
    %20 = arith.subi %18, %2 : vector<4x256xi32>
    %21 = arith.subi %19, %5 : vector<4x256xi32>
    %c0_i32_6 = arith.constant 0 : i32
    %22 = vector.broadcast %c0_i32_6 : i32 to vector<4x256xi32>
    %23 = arith.cmpi eq, %20, %22 : vector<4x256xi32>
    %c-2_i32_7 = arith.constant -2 : i32
    %24 = vector.broadcast %c-2_i32_7 : i32 to vector<4x256xi32>
    %25 = arith.cmpi sge, %21, %24 : vector<4x256xi32>
    %26 = arith.andi %23, %25 : vector<4x256xi1>
    %c2_i32_8 = arith.constant 2 : i32
    %27 = vector.broadcast %c2_i32_8 : i32 to vector<4x256xi32>
    %28 = arith.cmpi sle, %21, %27 : vector<4x256xi32>
    %29 = arith.andi %26, %28 : vector<4x256xi1>
    %c254_i32 = arith.constant 254 : i32
    %30 = tpu.dynamic_rotate %2 by %c254_i32 dim 1 : vector<4x256xi32>, i32 -> vector<4x256xi32>
    %c254_i32_9 = arith.constant 254 : i32
    %31 = tpu.dynamic_rotate %5 by %c254_i32_9 dim 1 : vector<4x256xi32>, i32 -> vector<4x256xi32>
    %32 = arith.subi %30, %2 : vector<4x256xi32>
    %33 = arith.subi %31, %5 : vector<4x256xi32>
    %c0_i32_10 = arith.constant 0 : i32
    %34 = vector.broadcast %c0_i32_10 : i32 to vector<4x256xi32>
    %35 = arith.cmpi eq, %32, %34 : vector<4x256xi32>
    %c-2_i32_11 = arith.constant -2 : i32
    %36 = vector.broadcast %c-2_i32_11 : i32 to vector<4x256xi32>
    %37 = arith.cmpi sge, %33, %36 : vector<4x256xi32>
    %38 = arith.andi %35, %37 : vector<4x256xi1>
    %c2_i32_12 = arith.constant 2 : i32
    %39 = vector.broadcast %c2_i32_12 : i32 to vector<4x256xi32>
    %40 = arith.cmpi sle, %33, %39 : vector<4x256xi32>
    %41 = arith.andi %38, %40 : vector<4x256xi1>
    %c255_i32 = arith.constant 255 : i32
    %42 = tpu.dynamic_rotate %2 by %c255_i32 dim 1 : vector<4x256xi32>, i32 -> vector<4x256xi32>
    %c255_i32_13 = arith.constant 255 : i32
    %43 = tpu.dynamic_rotate %5 by %c255_i32_13 dim 1 : vector<4x256xi32>, i32 -> vector<4x256xi32>
    %44 = arith.subi %42, %2 : vector<4x256xi32>
    %45 = arith.subi %43, %5 : vector<4x256xi32>
    %c0_i32_14 = arith.constant 0 : i32
    %46 = vector.broadcast %c0_i32_14 : i32 to vector<4x256xi32>
    %47 = arith.cmpi eq, %44, %46 : vector<4x256xi32>
    %c-2_i32_15 = arith.constant -2 : i32
    %48 = vector.broadcast %c-2_i32_15 : i32 to vector<4x256xi32>
    %49 = arith.cmpi sge, %45, %48 : vector<4x256xi32>
    %50 = arith.andi %47, %49 : vector<4x256xi1>
    %c2_i32_16 = arith.constant 2 : i32
    %51 = vector.broadcast %c2_i32_16 : i32 to vector<4x256xi32>
    %52 = arith.cmpi sle, %45, %51 : vector<4x256xi32>
    %53 = arith.andi %50, %52 : vector<4x256xi1>
    %c16_i32 = arith.constant 16 : i32
    %54 = tpu.dynamic_rotate %2 by %c16_i32 dim 1 : vector<4x256xi32>, i32 -> vector<4x256xi32>
    %c16_i32_17 = arith.constant 16 : i32
    %55 = tpu.dynamic_rotate %5 by %c16_i32_17 dim 1 : vector<4x256xi32>, i32 -> vector<4x256xi32>
    %56 = arith.subi %54, %2 : vector<4x256xi32>
    %57 = arith.subi %55, %5 : vector<4x256xi32>
    %c0_i32_18 = arith.constant 0 : i32
    %58 = vector.broadcast %c0_i32_18 : i32 to vector<4x256xi32>
    %59 = arith.cmpi eq, %57, %58 : vector<4x256xi32>
    %c-2_i32_19 = arith.constant -2 : i32
    %60 = vector.broadcast %c-2_i32_19 : i32 to vector<4x256xi32>
    %61 = arith.cmpi sge, %56, %60 : vector<4x256xi32>
    %62 = arith.andi %59, %61 : vector<4x256xi1>
    %c2_i32_20 = arith.constant 2 : i32
    %63 = vector.broadcast %c2_i32_20 : i32 to vector<4x256xi32>
    %64 = arith.cmpi sle, %56, %63 : vector<4x256xi32>
    %65 = arith.andi %62, %64 : vector<4x256xi1>
    %c32_i32 = arith.constant 32 : i32
    %66 = tpu.dynamic_rotate %2 by %c32_i32 dim 1 : vector<4x256xi32>, i32 -> vector<4x256xi32>
    %c32_i32_21 = arith.constant 32 : i32
    %67 = tpu.dynamic_rotate %5 by %c32_i32_21 dim 1 : vector<4x256xi32>, i32 -> vector<4x256xi32>
    %68 = arith.subi %66, %2 : vector<4x256xi32>
    %69 = arith.subi %67, %5 : vector<4x256xi32>
    %c0_i32_22 = arith.constant 0 : i32
    %70 = vector.broadcast %c0_i32_22 : i32 to vector<4x256xi32>
    %71 = arith.cmpi eq, %69, %70 : vector<4x256xi32>
    %c-2_i32_23 = arith.constant -2 : i32
    %72 = vector.broadcast %c-2_i32_23 : i32 to vector<4x256xi32>
    %73 = arith.cmpi sge, %68, %72 : vector<4x256xi32>
    %74 = arith.andi %71, %73 : vector<4x256xi1>
    %c2_i32_24 = arith.constant 2 : i32
    %75 = vector.broadcast %c2_i32_24 : i32 to vector<4x256xi32>
    %76 = arith.cmpi sle, %68, %75 : vector<4x256xi32>
    %77 = arith.andi %74, %76 : vector<4x256xi1>
    %c224_i32 = arith.constant 224 : i32
    %78 = tpu.dynamic_rotate %2 by %c224_i32 dim 1 : vector<4x256xi32>, i32 -> vector<4x256xi32>
    %c224_i32_25 = arith.constant 224 : i32
    %79 = tpu.dynamic_rotate %5 by %c224_i32_25 dim 1 : vector<4x256xi32>, i32 -> vector<4x256xi32>
    %80 = arith.subi %78, %2 : vector<4x256xi32>
    %81 = arith.subi %79, %5 : vector<4x256xi32>
    %c0_i32_26 = arith.constant 0 : i32
    %82 = vector.broadcast %c0_i32_26 : i32 to vector<4x256xi32>
    %83 = arith.cmpi eq, %81, %82 : vector<4x256xi32>
    %c-2_i32_27 = arith.constant -2 : i32
    %84 = vector.broadcast %c-2_i32_27 : i32 to vector<4x256xi32>
    %85 = arith.cmpi sge, %80, %84 : vector<4x256xi32>
    %86 = arith.andi %83, %85 : vector<4x256xi1>
    %c2_i32_28 = arith.constant 2 : i32
    %87 = vector.broadcast %c2_i32_28 : i32 to vector<4x256xi32>
    %88 = arith.cmpi sle, %80, %87 : vector<4x256xi32>
    %89 = arith.andi %86, %88 : vector<4x256xi1>
    %c240_i32 = arith.constant 240 : i32
    %90 = tpu.dynamic_rotate %2 by %c240_i32 dim 1 : vector<4x256xi32>, i32 -> vector<4x256xi32>
    %c240_i32_29 = arith.constant 240 : i32
    %91 = tpu.dynamic_rotate %5 by %c240_i32_29 dim 1 : vector<4x256xi32>, i32 -> vector<4x256xi32>
    %92 = arith.subi %90, %2 : vector<4x256xi32>
    %93 = arith.subi %91, %5 : vector<4x256xi32>
    %c0_i32_30 = arith.constant 0 : i32
    %94 = vector.broadcast %c0_i32_30 : i32 to vector<4x256xi32>
    %95 = arith.cmpi eq, %93, %94 : vector<4x256xi32>
    %c-2_i32_31 = arith.constant -2 : i32
    %96 = vector.broadcast %c-2_i32_31 : i32 to vector<4x256xi32>
    %97 = arith.cmpi sge, %92, %96 : vector<4x256xi32>
    %98 = arith.andi %95, %97 : vector<4x256xi1>
    %c2_i32_32 = arith.constant 2 : i32
    %99 = vector.broadcast %c2_i32_32 : i32 to vector<4x256xi32>
    %100 = arith.cmpi sle, %92, %99 : vector<4x256xi32>
    %101 = arith.andi %98, %100 : vector<4x256xi1>
    %c0_33 = arith.constant 0 : index
    %c0_34 = arith.constant 0 : index
    %c0_35 = arith.constant 0 : index
    %102 = vector.load %arg2[%c0_33, %c0_34, %c0_35] : memref<1x4x256xf32, #tpu.memory_space<vmem>>, vector<1x4x256xf32>
    %103 = vector.shape_cast %102 : vector<1x4x256xf32> to vector<4x256xf32>
    %c1_i32_36 = arith.constant 1 : i32
    %104 = tpu.dynamic_rotate %103 by %c1_i32_36 dim 1 : vector<4x256xf32>, i32 -> vector<4x256xf32>
    %cst = arith.constant 0xFF800000 : f32
    %105 = vector.broadcast %cst : f32 to vector<4x256xf32>
    %106 = arith.select %17, %104, %105 : vector<4x256xi1>, vector<4x256xf32>
    %107 = arith.maximumf %103, %106 : vector<4x256xf32>
    %c2_i32_37 = arith.constant 2 : i32
    %108 = tpu.dynamic_rotate %103 by %c2_i32_37 dim 1 : vector<4x256xf32>, i32 -> vector<4x256xf32>
    %cst_38 = arith.constant 0xFF800000 : f32
    %109 = vector.broadcast %cst_38 : f32 to vector<4x256xf32>
    %110 = arith.select %29, %108, %109 : vector<4x256xi1>, vector<4x256xf32>
    %111 = arith.maximumf %107, %110 : vector<4x256xf32>
    %c254_i32_39 = arith.constant 254 : i32
    %112 = tpu.dynamic_rotate %103 by %c254_i32_39 dim 1 : vector<4x256xf32>, i32 -> vector<4x256xf32>
    %cst_40 = arith.constant 0xFF800000 : f32
    %113 = vector.broadcast %cst_40 : f32 to vector<4x256xf32>
    %114 = arith.select %41, %112, %113 : vector<4x256xi1>, vector<4x256xf32>
    %115 = arith.maximumf %111, %114 : vector<4x256xf32>
    %c255_i32_41 = arith.constant 255 : i32
    %116 = tpu.dynamic_rotate %103 by %c255_i32_41 dim 1 : vector<4x256xf32>, i32 -> vector<4x256xf32>
    %cst_42 = arith.constant 0xFF800000 : f32
    %117 = vector.broadcast %cst_42 : f32 to vector<4x256xf32>
    %118 = arith.select %53, %116, %117 : vector<4x256xi1>, vector<4x256xf32>
    %119 = arith.maximumf %115, %118 : vector<4x256xf32>
    %c16_i32_43 = arith.constant 16 : i32
    %120 = tpu.dynamic_rotate %119 by %c16_i32_43 dim 1 : vector<4x256xf32>, i32 -> vector<4x256xf32>
    %cst_44 = arith.constant 0xFF800000 : f32
    %121 = vector.broadcast %cst_44 : f32 to vector<4x256xf32>
    %122 = arith.select %65, %120, %121 : vector<4x256xi1>, vector<4x256xf32>
    %123 = arith.maximumf %119, %122 : vector<4x256xf32>
    %c32_i32_45 = arith.constant 32 : i32
    %124 = tpu.dynamic_rotate %119 by %c32_i32_45 dim 1 : vector<4x256xf32>, i32 -> vector<4x256xf32>
    %cst_46 = arith.constant 0xFF800000 : f32
    %125 = vector.broadcast %cst_46 : f32 to vector<4x256xf32>
    %126 = arith.select %77, %124, %125 : vector<4x256xi1>, vector<4x256xf32>
    %127 = arith.maximumf %123, %126 : vector<4x256xf32>
    %c224_i32_47 = arith.constant 224 : i32
    %128 = tpu.dynamic_rotate %119 by %c224_i32_47 dim 1 : vector<4x256xf32>, i32 -> vector<4x256xf32>
    %cst_48 = arith.constant 0xFF800000 : f32
    %129 = vector.broadcast %cst_48 : f32 to vector<4x256xf32>
    %130 = arith.select %89, %128, %129 : vector<4x256xi1>, vector<4x256xf32>
    %131 = arith.maximumf %127, %130 : vector<4x256xf32>
    %c240_i32_49 = arith.constant 240 : i32
    %132 = tpu.dynamic_rotate %119 by %c240_i32_49 dim 1 : vector<4x256xf32>, i32 -> vector<4x256xf32>
    %cst_50 = arith.constant 0xFF800000 : f32
    %133 = vector.broadcast %cst_50 : f32 to vector<4x256xf32>
    %134 = arith.select %101, %132, %133 : vector<4x256xi1>, vector<4x256xf32>
    %135 = arith.maximumf %131, %134 : vector<4x256xf32>
    %c1_i32_51 = arith.constant 1 : i32
    %136 = tpu.dynamic_rotate %135 by %c1_i32_51 dim 1 : vector<4x256xf32>, i32 -> vector<4x256xf32>
    %cst_52 = arith.constant 0xFF800000 : f32
    %137 = vector.broadcast %cst_52 : f32 to vector<4x256xf32>
    %138 = arith.select %17, %136, %137 : vector<4x256xi1>, vector<4x256xf32>
    %139 = arith.maximumf %135, %138 : vector<4x256xf32>
    %c2_i32_53 = arith.constant 2 : i32
    %140 = tpu.dynamic_rotate %135 by %c2_i32_53 dim 1 : vector<4x256xf32>, i32 -> vector<4x256xf32>
    %cst_54 = arith.constant 0xFF800000 : f32
    %141 = vector.broadcast %cst_54 : f32 to vector<4x256xf32>
    %142 = arith.select %29, %140, %141 : vector<4x256xi1>, vector<4x256xf32>
    %143 = arith.maximumf %139, %142 : vector<4x256xf32>
    %c254_i32_55 = arith.constant 254 : i32
    %144 = tpu.dynamic_rotate %135 by %c254_i32_55 dim 1 : vector<4x256xf32>, i32 -> vector<4x256xf32>
    %cst_56 = arith.constant 0xFF800000 : f32
    %145 = vector.broadcast %cst_56 : f32 to vector<4x256xf32>
    %146 = arith.select %41, %144, %145 : vector<4x256xi1>, vector<4x256xf32>
    %147 = arith.maximumf %143, %146 : vector<4x256xf32>
    %c255_i32_57 = arith.constant 255 : i32
    %148 = tpu.dynamic_rotate %135 by %c255_i32_57 dim 1 : vector<4x256xf32>, i32 -> vector<4x256xf32>
    %cst_58 = arith.constant 0xFF800000 : f32
    %149 = vector.broadcast %cst_58 : f32 to vector<4x256xf32>
    %150 = arith.select %53, %148, %149 : vector<4x256xi1>, vector<4x256xf32>
    %151 = arith.maximumf %147, %150 : vector<4x256xf32>
    %c16_i32_59 = arith.constant 16 : i32
    %152 = tpu.dynamic_rotate %151 by %c16_i32_59 dim 1 : vector<4x256xf32>, i32 -> vector<4x256xf32>
    %cst_60 = arith.constant 0xFF800000 : f32
    %153 = vector.broadcast %cst_60 : f32 to vector<4x256xf32>
    %154 = arith.select %65, %152, %153 : vector<4x256xi1>, vector<4x256xf32>
    %155 = arith.maximumf %151, %154 : vector<4x256xf32>
    %c32_i32_61 = arith.constant 32 : i32
    %156 = tpu.dynamic_rotate %151 by %c32_i32_61 dim 1 : vector<4x256xf32>, i32 -> vector<4x256xf32>
    %cst_62 = arith.constant 0xFF800000 : f32
    %157 = vector.broadcast %cst_62 : f32 to vector<4x256xf32>
    %158 = arith.select %77, %156, %157 : vector<4x256xi1>, vector<4x256xf32>
    %159 = arith.maximumf %155, %158 : vector<4x256xf32>
    %c224_i32_63 = arith.constant 224 : i32
    %160 = tpu.dynamic_rotate %151 by %c224_i32_63 dim 1 : vector<4x256xf32>, i32 -> vector<4x256xf32>
    %cst_64 = arith.constant 0xFF800000 : f32
    %161 = vector.broadcast %cst_64 : f32 to vector<4x256xf32>
    %162 = arith.select %89, %160, %161 : vector<4x256xi1>, vector<4x256xf32>
    %163 = arith.maximumf %159, %162 : vector<4x256xf32>
    %c240_i32_65 = arith.constant 240 : i32
    %164 = tpu.dynamic_rotate %151 by %c240_i32_65 dim 1 : vector<4x256xf32>, i32 -> vector<4x256xf32>
    %cst_66 = arith.constant 0xFF800000 : f32
    %165 = vector.broadcast %cst_66 : f32 to vector<4x256xf32>
    %166 = arith.select %101, %164, %165 : vector<4x256xi1>, vector<4x256xf32>
    %167 = arith.maximumf %163, %166 : vector<4x256xf32>
    %c1_i32_67 = arith.constant 1 : i32
    %168 = tpu.dynamic_rotate %167 by %c1_i32_67 dim 1 : vector<4x256xf32>, i32 -> vector<4x256xf32>
    %cst_68 = arith.constant 0xFF800000 : f32
    %169 = vector.broadcast %cst_68 : f32 to vector<4x256xf32>
    %170 = arith.select %17, %168, %169 : vector<4x256xi1>, vector<4x256xf32>
    %171 = arith.maximumf %167, %170 : vector<4x256xf32>
    %c2_i32_69 = arith.constant 2 : i32
    %172 = tpu.dynamic_rotate %167 by %c2_i32_69 dim 1 : vector<4x256xf32>, i32 -> vector<4x256xf32>
    %cst_70 = arith.constant 0xFF800000 : f32
    %173 = vector.broadcast %cst_70 : f32 to vector<4x256xf32>
    %174 = arith.select %29, %172, %173 : vector<4x256xi1>, vector<4x256xf32>
    %175 = arith.maximumf %171, %174 : vector<4x256xf32>
    %c254_i32_71 = arith.constant 254 : i32
    %176 = tpu.dynamic_rotate %167 by %c254_i32_71 dim 1 : vector<4x256xf32>, i32 -> vector<4x256xf32>
    %cst_72 = arith.constant 0xFF800000 : f32
    %177 = vector.broadcast %cst_72 : f32 to vector<4x256xf32>
    %178 = arith.select %41, %176, %177 : vector<4x256xi1>, vector<4x256xf32>
    %179 = arith.maximumf %175, %178 : vector<4x256xf32>
    %c255_i32_73 = arith.constant 255 : i32
    %180 = tpu.dynamic_rotate %167 by %c255_i32_73 dim 1 : vector<4x256xf32>, i32 -> vector<4x256xf32>
    %cst_74 = arith.constant 0xFF800000 : f32
    %181 = vector.broadcast %cst_74 : f32 to vector<4x256xf32>
    %182 = arith.select %53, %180, %181 : vector<4x256xi1>, vector<4x256xf32>
    %183 = arith.maximumf %179, %182 : vector<4x256xf32>
    %c16_i32_75 = arith.constant 16 : i32
    %184 = tpu.dynamic_rotate %183 by %c16_i32_75 dim 1 : vector<4x256xf32>, i32 -> vector<4x256xf32>
    %cst_76 = arith.constant 0xFF800000 : f32
    %185 = vector.broadcast %cst_76 : f32 to vector<4x256xf32>
    %186 = arith.select %65, %184, %185 : vector<4x256xi1>, vector<4x256xf32>
    %187 = arith.maximumf %183, %186 : vector<4x256xf32>
    %c32_i32_77 = arith.constant 32 : i32
    %188 = tpu.dynamic_rotate %183 by %c32_i32_77 dim 1 : vector<4x256xf32>, i32 -> vector<4x256xf32>
    %cst_78 = arith.constant 0xFF800000 : f32
    %189 = vector.broadcast %cst_78 : f32 to vector<4x256xf32>
    %190 = arith.select %77, %188, %189 : vector<4x256xi1>, vector<4x256xf32>
    %191 = arith.maximumf %187, %190 : vector<4x256xf32>
    %c224_i32_79 = arith.constant 224 : i32
    %192 = tpu.dynamic_rotate %183 by %c224_i32_79 dim 1 : vector<4x256xf32>, i32 -> vector<4x256xf32>
    %cst_80 = arith.constant 0xFF800000 : f32
    %193 = vector.broadcast %cst_80 : f32 to vector<4x256xf32>
    %194 = arith.select %89, %192, %193 : vector<4x256xi1>, vector<4x256xf32>
    %195 = arith.maximumf %191, %194 : vector<4x256xf32>
    %c240_i32_81 = arith.constant 240 : i32
    %196 = tpu.dynamic_rotate %183 by %c240_i32_81 dim 1 : vector<4x256xf32>, i32 -> vector<4x256xf32>
    %cst_82 = arith.constant 0xFF800000 : f32
    %197 = vector.broadcast %cst_82 : f32 to vector<4x256xf32>
    %198 = arith.select %101, %196, %197 : vector<4x256xi1>, vector<4x256xf32>
    %199 = arith.maximumf %195, %198 : vector<4x256xf32>
    %c0_83 = arith.constant 0 : index
    %c0_84 = arith.constant 0 : index
    %c0_85 = arith.constant 0 : index
    %c0_86 = arith.constant 0 : index
    %200 = vector.load %arg5[%c0_83, %c0_84, %c0_85, %c0_86] : memref<1x4x4x256xf32, #tpu.memory_space<vmem>>, vector<1x1x4x256xf32>
    %201 = vector.shape_cast %200 : vector<1x1x4x256xf32> to vector<4x256xf32>
    %202 = vector.shape_cast %103 : vector<4x256xf32> to vector<1x1x4x256xf32>
    tpu.vector_store %arg5[%c0_83, %c0_84, %c0_85, %c0_86], %202 {strides = array<i32>} : memref<1x4x4x256xf32, #tpu.memory_space<vmem>>, vector<1x1x4x256xf32>,
    %c0_87 = arith.constant 0 : index
    %c1 = arith.constant 1 : index
    %c0_88 = arith.constant 0 : index
    %c0_89 = arith.constant 0 : index
    %203 = vector.load %arg5[%c0_87, %c1, %c0_88, %c0_89] : memref<1x4x4x256xf32, #tpu.memory_space<vmem>>, vector<1x1x4x256xf32>
    %204 = vector.shape_cast %203 : vector<1x1x4x256xf32> to vector<4x256xf32>
    %205 = vector.shape_cast %135 : vector<4x256xf32> to vector<1x1x4x256xf32>
    tpu.vector_store %arg5[%c0_87, %c1, %c0_88, %c0_89], %205 {strides = array<i32>} : memref<1x4x4x256xf32, #tpu.memory_space<vmem>>, vector<1x1x4x256xf32>,
    %c0_90 = arith.constant 0 : index
    %c2 = arith.constant 2 : index
    %c0_91 = arith.constant 0 : index
    %c0_92 = arith.constant 0 : index
    %206 = vector.load %arg5[%c0_90, %c2, %c0_91, %c0_92] : memref<1x4x4x256xf32, #tpu.memory_space<vmem>>, vector<1x1x4x256xf32>
    %207 = vector.shape_cast %206 : vector<1x1x4x256xf32> to vector<4x256xf32>
    %208 = vector.shape_cast %167 : vector<4x256xf32> to vector<1x1x4x256xf32>
    tpu.vector_store %arg5[%c0_90, %c2, %c0_91, %c0_92], %208 {strides = array<i32>} : memref<1x4x4x256xf32, #tpu.memory_space<vmem>>, vector<1x1x4x256xf32>,
    %c0_93 = arith.constant 0 : index
    %c3 = arith.constant 3 : index
    %c0_94 = arith.constant 0 : index
    %c0_95 = arith.constant 0 : index
    %209 = vector.load %arg5[%c0_93, %c3, %c0_94, %c0_95] : memref<1x4x4x256xf32, #tpu.memory_space<vmem>>, vector<1x1x4x256xf32>
    %210 = vector.shape_cast %209 : vector<1x1x4x256xf32> to vector<4x256xf32>
    %211 = vector.shape_cast %199 : vector<4x256xf32> to vector<1x1x4x256xf32>
    tpu.vector_store %arg5[%c0_93, %c3, %c0_94, %c0_95], %211 {strides = array<i32>} : memref<1x4x4x256xf32, #tpu.memory_space<vmem>>, vector<1x1x4x256xf32>,
    return
  }
  func.func @transform_0(%arg0: i32, %arg1: i32) -> (i32, i32, i32) {
    %c0_i32 = arith.constant 0 : i32
    %c0_i32_0 = arith.constant 0 : i32
    return %arg0, %arg1, %c0_i32 : i32, i32, i32
  }
  func.func @transform_1(%arg0: i32, %arg1: i32) -> (i32, i32) {
    %c0_i32 = arith.constant 0 : i32
    %c0_i32_0 = arith.constant 0 : i32
    %c0_i32_1 = arith.constant 0 : i32
    return %c0_i32, %c0_i32_0 : i32, i32
  }
  func.func @transform_2(%arg0: i32, %arg1: i32) -> (i32, i32) {
    %c0_i32 = arith.constant 0 : i32
    %c0_i32_0 = arith.constant 0 : i32
    %c0_i32_1 = arith.constant 0 : i32
    return %c0_i32, %c0_i32_0 : i32, i32
  }
  func.func @transform_3(%arg0: i32, %arg1: i32) -> (i32, i32, i32, i32) {
    %c0_i32 = arith.constant 0 : i32
    %c0_i32_0 = arith.constant 0 : i32
    %c0_i32_1 = arith.constant 0 : i32
    return %arg0, %c0_i32, %arg1, %c0_i32_0 : i32, i32, i32, i32
  }
}

</mosaic_0001>

<bundles_post_ra>
// kernel: tpu_custom_call.1
= control target key start
LH: loop header
LB: loop body
LE: loop exit
PB: predicated region body
PF: predicated region fallthrough
CT: control target
= control target key end

     0   :  { %8 = vsyncpa [#allocation3], 0  ;;  %s1881_s0 = inlined_call_operand.hbm [shape: f32[2,4,256], index: 0, kind: input, shape index: {}]   ;;  %s1882_s1 = inlined_call_operand.vmem [shape: s32[1,256], index: 1, kind: input, shape index: {}]   ;;  %s1883_s2 = inlined_call_operand.vmem [shape: s32[1,256], index: 2, kind: input, shape index: {}]   ;;  %s1884_s3 = inlined_call_operand.hbm [shape: f32[2,4,4,256], index: 3, kind: output, shape index: {}]  }
   0x1   :  { %10 = vsyncpa [#allocation3 + $0x1], 0 }
   0x2   :  { %11 = vsyncpa [#allocation4], 0 }
   0x3   :  { %13 = vsyncpa [#allocation4 + $0x1], 0  ;;  %s1121_s12 = smov 0   ;;  %s1123_s13 = smov 0  }
   0x4   :  { %s1125_s14 = smov 0   ;;  %s1127_s15 = smov 0  }
   0x5   :  { %s1129_s16 = smov 0   ;;  %s1131_s17 = smov 0  }
   0x6 LB: > { %s882_s18 = sadd.s32 4294967295, %s1087_s17   ;;  %s883_s19 = sadd.s32 4294967294, %s1087_s17   ;;  %s1087_s17 = sphi %s1131_s17, %s19_s17   ;;  %s1083_s16 = sphi %s1129_s16, %s2049_s16   ;;  %s1079_s15 = sphi %s1127_s15, %s2048_s15   ;;  %s1075_s14 = sphi %s1125_s14, %s2047_s14   ;;  %s1071_s13 = sphi %s1123_s13, %s2046_s13   ;;  %s1067_s12 = sphi %s1121_s12, %s2045_s12  }
   0x7   : > { %s31_s20 = sadd.s32 1, %s1083_s16  ;;  %s40_s21 = sadd.s32 1, %s1075_s14 }
   0x8   : > { %p33_p0 = scmp.ge.s32.totalorder %s31_s20, 2  ;;  %p47_p1 = scmp.ne.s32.totalorder %s1075_s14, %s1071_s13 }
   0x9   : > { %p48_p2 = scmp.eq.s32.totalorder %s1087_s17, 0  ;;  %p53_p3 = scmp.ne.s32.totalorder %s1071_s13, %s1067_s12 }
   0xa   : > { %s2051_s20 = smov (%p33_p0, %s31_s20), 0  ;;  %p54_p5 = scmp.eq.s32.totalorder %s882_s18, 0 }
   0xb   : > { %p1162_p4 = por %p48_p2, %p47_p1  ;;  %s35_s23 = ssub.s32 %s1083_s16, %s2051_s20 }
   0xc   : > { %p121_p6 = scmp.eq.s32.totalorder %s882_s18, 1  ;;  %p38_p7 = scmp.eq.s32.totalorder %s35_s23, 0 }
   0xd   : > { %p1168_p8 = por %p54_p5, %p53_p3  ;;  %p127_p10 = scmp.eq.s32.totalorder %s883_s19, 1 }
   0xe   : > { %p1172_p9 = por %p121_p6, %p47_p1  ;;  %p914_p13 = scmp.lt.s32.totalorder %s1087_s17, 2 }
   0xf   : > { %s1177_s26 = scalar_select %p38_p7, %s1075_s14, %s40_s21  }
  0x10   : > { %s1919_s25 = scalar_select %p1172_p9, 1, 0 }
  0x11   : > { %p1179_p11 = por %p127_p10, %p53_p3  ;;  %s153_s28 = sand.u32 1, %s1075_s14  }
  0x12   : > { %s886_s29 = sshll.u32 %s153_s28, 3  ;;  %s900_s30 = sshll.u32 %s1083_s16, 7 }
  0x13   : > { %s1920_s27 = scalar_select %p1179_p11, 1, 0 }
  0x14   : > { %s1190_s6 = scalar_lea.hbm %s1881_s0, %s900_s30  ;;  %s157_s7 = scalar_lea.vmem [#allocation2], %s886_s29 }
  0x15   : > { %s167_s8 = sshll.u32 %s157_s7, 4  ;;  %p1196_p0 = pnand %p914_p13, %p1162_p4  ;;  %s1192_s8 = int_to_ptr.vmem [resolvable:$true] %s167_s8 }
  0x16   : > { %s154_s10 = scalar_lea.sflag [#allocation3], %s153_s28  ;;  %s975_s11 = scalar_lea.hbm %s1190_s6, 128 }
  0x17   : > { %p976_p3 = scmp.ne.s32.totalorder %s1190_s6, %s975_s11  ;;  %p977_p5 = pneg %p1196_p0 }
  0x18   : > { %s980_s21 = scalar_lea.hbm %s1881_s0, 256  ;;  %p981_p4 = scmp.lt.u32.totalorder %s1190_s6, %s1881_s0 }
  0x19   : > { %p978_p6 = pnand %p977_p5, %p976_p3  ;;  %p982_p10 = scmp.lt.u32.totalorder %s980_s21, %s975_s11 }
  0x1a   : > { %p984_p12 = scmp.lt.u32.totalorder %s975_s11, %s1190_s6 }
  0x1b   : > { %p979_p7 = pneg %p978_p6  ;;  %p983_p13 = por %p982_p10, %p981_p4 }
  0x1d   : > { %p985_p1 = por %p984_p12, %p983_p13 }
  0x1f   : > { %p986_p2 = pnand %p985_p1, %p979_p7 }
  0x21   : > { %989 = shalt.err (!%p986_p2)
}
  0x22   : > { %s990_s28 = scalar_lea.vmem %s1192_s8, 128  ;;  %s1089_s29 = smov [#allocation2]  }
  0x23   : > { %p991_p3 = scmp.ne.s32.totalorder %s1192_s8, %s990_s28  ;;  %s995_s30 = sshll.u32 %s1089_s29, 4  ;;  %s996_s30 = int_to_ptr.vmem [resolvable:$false] %s995_s30 }
  0x24   : > { %s997_s4 = scalar_lea.vmem %s996_s30, 256  ;;  %p998_p9 = scmp.lt.s32.totalorder %s1192_s8, %s996_s30 }
  0x25   : > { %p993_p6 = pnand %p991_p3, %p977_p5  ;;  %p999_p4 = scmp.lt.s32.totalorder %s997_s4, %s990_s28 }
  0x27   : > { %p994_p11 = pneg %p993_p6  ;;  %p1000_p10 = por %p999_p4, %p998_p9 }
  0x29   : > { %p1001_p12 = pnand %p1000_p10, %p994_p11 }
  0x2b   : > { %1004 = shalt.err (!%p1001_p12)
}
  0x2c   : > { %909 = dma.hbm_to_vmem [thread:$0]  (!%p1196_p0), %s1190_s6, 128, %s1192_s8, %s154_s10  }
  0x2d   : > { %p1922_p1 = scmp.lt.s32.totalorder %s1087_s17, 3  ;;  %p1923_p2 = scmp.ge.s32.totalorder %s1087_s17, 1 }
  0x2f   : > { %p173_p5 = pnand %p1923_p2, %p1922_p1 }
  0x30   : > { %s1232_s5 = sand.u32 (!%p173_p5), 1, %s1071_s13  }
  0x31   : > { %176 = sbr.rel (%p173_p5) target bundleno = 920 (0x398), region = 32  ;;  %s890_s7 = sshll.u32 (!%p173_p5), %s1232_s5, 3 }
  0x32   : > { %s179_s11 = scalar_lea.sflag (!%p173_p5), [#allocation3], %s1232_s5  ;;  %s182_s18 = scalar_lea.vmem (!%p173_p5), [#allocation2], %s890_s7 }
  0x38   : > { %1058 = dma.done.wait (%p1168_p8), %s179_s11, 128  }
  0x39   : > { %1060 = vsyncadd (%p1168_p8), %s179_s11, 4294967168  ;;  %v206_v0 = vlaneseq  ;;  %s891_s6 = sshll.u32 %s1232_s5, 5  ;;  %v205_v4 = vld [vmem:[%s1882_s1] sm:$0x3]  ;;  %s1090_s21 = smov 1   ;;  %v1926_v52 = vmov 0 }
  0x3a   : > { %v214_v5 = vld [vmem:[%s1883_s2] sm:$0x3]  ;;  %s1254_s24 = scalar_lea.vmem [#allocation5], %s891_s6  ;;  %s1091_s22 = smov 2   ;;  %v1932_v61 = vmov 0 }
  0x3b   : > { %v207_v1 = vshrl.u32 %v206_v0, 7  ;;  %v1248_v6 = vld [vmem:[%s182_s18] sm:$0xff]  ;;  %s1092_s23 = smov 126   ;;  %s1093_s28 = smov 127   ;;  %v1341_v18 = vand.u32 127, %v206_v0 }
  0x3c   : > { %772 = vst [vmem:[%s1254_s24] sm:$0xff] %v1248_v6  ;;  %v443_v11 = vcombine.high %v1248_v6, %v1248_v6  ;;  %s1094_s29 = smov 16   ;;  %s1095_s30 = smov 32  }
  0x3d   : > { %v208_v2 = vsub.s32 0, %v207_v1  ;;  %v212_v3 = vsub.s32 1, %v207_v1  ;;  %s1096_s4 = smov 96   ;;  %s1097_s7 = smov 112   ;;  %vm1886_vm0 = vcmp.lt.s32.totalorder %v1341_v18, 1  ;;  %vm1888_vm1 = vcmp.lt.s32.totalorder %v1341_v18, 2 }
  0x3e   : > { %vm1889_vm2 = vcmp.lt.s32.totalorder %v1341_v18, 126  ;;  %vm1887_vm15 = vcmp.lt.s32.totalorder %v1341_v18, 127  ;;  %s901_s11 = sshll.u32 %s1079_s15, 9  ;;  %s795_s18 = sshll.u32 %s1254_s24, 4  ;;  %s1831_s18 = int_to_ptr.vmem [resolvable:$true] %s795_s18 }
  0x3f   : > { %v1250_v7 = vrot.slane %v205_v4, %v208_v2  ;;  %v1252_v8 = vrot.slane %v214_v5, %v208_v2  ;;  %v1258_v9 = vrot.slane %v205_v4, %v212_v3  ;;  %v1260_v10 = vrot.slane %v214_v5, %v212_v3  ;;  %s1829_s9 = scalar_lea.hbm %s1884_s3, %s901_s11  ;;  %s780_s15 = scalar_lea.sflag [#allocation4], %s1232_s5 }
  0x40   : > { %v1934_v3 = vmov 0  ;;  %v1936_v5 = vmov 0  ;;  %s1005_s10 = scalar_lea.vmem %s1831_s18, 512  ;;  %p2042_p9 = scmp.ne.s32.totalorder %s1919_s25, 0 }
  0x41   : > { %232 = vrot.lane.b32.xlu1 %v1252_v8, %s1090_s21  ;;  %223 = vrot.lane.b32.xlu0 %v1250_v7, %s1090_s21  ;;  %p1006_p8 = scmp.ne.s32.totalorder %s1831_s18, %s1005_s10  ;;  %s1098_s19 = smov [#allocation5]  }
  0x43   : > { %p1007_p11 = pnand %p1006_p8, %p2042_p9 }
  0x45   : > { %234 = vrot.lane.b32.xlu1 %v1260_v10, %s1090_s21  ;;  %225 = vrot.lane.b32.xlu0 %v1258_v9, %s1090_s21  ;;  %p1008_p0 = pneg %p1007_p11 }
  0x49   : > { %254 = vrot.lane.b32.xlu1 %v1258_v9, %s1091_s22  ;;  %252 = vrot.lane.b32.xlu0 %v1250_v7, %s1091_s22 }
  0x4d   : > { %261 = vrot.lane.b32.xlu1 %v1260_v10, %s1091_s22  ;;  %259 = vrot.lane.b32.xlu0 %v1252_v8, %s1091_s22 }
  0x51   : > { %281 = vrot.lane.b32.xlu1 %v1258_v9, %s1092_s23  ;;  %279 = vrot.lane.b32.xlu0 %v1250_v7, %s1092_s23 }
  0x55   : > { %288 = vrot.lane.b32.xlu1 %v1260_v10, %s1092_s23  ;;  %286 = vrot.lane.b32.xlu0 %v1252_v8, %s1092_s23 }
  0x59   : > { %447 = vrot.lane.b32.xlu1 %v443_v11, %s1090_s21  ;;  %445 = vrot.lane.b32.xlu0 %v1248_v6, %s1090_s21 }
  0x5d   : > { %308 = vrot.lane.b32.xlu1 %v1258_v9, %s1093_s28  ;;  %306 = vrot.lane.b32.xlu0 %v1250_v7, %s1093_s28 }
  0x61   : > { %315 = vrot.lane.b32.xlu1 %v1260_v10, %s1093_s28  ;;  %313 = vrot.lane.b32.xlu0 %v1252_v8, %s1093_s28 }
  0x65   : > { %460 = vrot.lane.b32.xlu1 %v443_v11, %s1091_s22  ;;  %458 = vrot.lane.b32.xlu0 %v1248_v6, %s1091_s22 }
  0x69   : > { %473 = vrot.lane.b32.xlu1 %v443_v11, %s1092_s23  ;;  %471 = vrot.lane.b32.xlu0 %v1248_v6, %s1092_s23 }
  0x6d   : > { %486 = vrot.lane.b32.xlu1 %v443_v11, %s1093_s28  ;;  %484 = vrot.lane.b32.xlu0 %v1248_v6, %s1093_s28 }
  0x71   : > { %335 = vrot.lane.b32.xlu1 %v1258_v9, %s1094_s29  ;;  %333 = vrot.lane.b32.xlu0 %v1250_v7, %s1094_s29 }
  0x75   : > { %342 = vrot.lane.b32.xlu1 %v1260_v10, %s1094_s29  ;;  %340 = vrot.lane.b32.xlu0 %v1252_v8, %s1094_s29 }
  0x79   : > { %362 = vrot.lane.b32.xlu1 %v1258_v9, %s1095_s30  ;;  %360 = vrot.lane.b32.xlu0 %v1250_v7, %s1095_s30 }
  0x7d   : > { %369 = vrot.lane.b32.xlu1 %v1260_v10, %s1095_s30  ;;  %367 = vrot.lane.b32.xlu0 %v1252_v8, %s1095_s30 }
  0x81   : > { %389 = vrot.lane.b32.xlu1 %v1258_v9, %s1096_s4  ;;  %387 = vrot.lane.b32.xlu0 %v1250_v7, %s1096_s4 }
  0x85   : > { %396 = vrot.lane.b32.xlu1 %v1260_v10, %s1096_s4  ;;  %394 = vrot.lane.b32.xlu0 %v1252_v8, %s1096_s4 }
  0x89   : > { %416 = vrot.lane.b32.xlu1 %v1258_v9, %s1097_s7  ;;  %414 = vrot.lane.b32.xlu0 %v1250_v7, %s1097_s7 }
  0x8d   : > { %423 = vrot.lane.b32.xlu1 %v1260_v10, %s1097_s7  ;;  %421 = vrot.lane.b32.xlu0 %v1252_v8, %s1097_s7 }
  0xb3   : > { %v233_v12 = vpop.permute.xlu1 %232  ;;  %v224_v13 = vpop.permute.xlu0 %223 }
  0xb7   : > { %v235_v14 = vpop.permute.xlu1 %234  ;;  %v226_v15 = vpop.permute.xlu0 %225 }
  0xb8   : > { %v237_v23 = vsel %vm1886_vm0, %v235_v14, %v233_v12  ;;  %v231_v24 = vsel %vm1886_vm0, %v226_v15, %v224_v13  ;;  %v236_v25 = vsel %vm1886_vm0, %v233_v12, %v235_v14  ;;  %v230_v26 = vsel %vm1886_vm0, %v224_v13, %v226_v15 }
  0xb9   : > { %v240_v27 = vsub.s32 %v237_v23, %v1252_v8  ;;  %v238_v28 = vsub.s32 %v231_v24, %v1250_v7  ;;  %v241_v32 = vsub.s32 %v236_v25, %v1260_v10  ;;  %v239_v33 = vsub.s32 %v230_v26, %v1258_v9 }
  0xba   : > { %v1940_v24 = vmov 0  ;;  %v1942_v26 = vmov 0 }
  0xbb   : > { %v255_v16 = vpop.permute.xlu1 %254  ;;  %v253_v17 = vpop.permute.xlu0 %252  ;;  %vm244_vm3 = vcmp.ge.s32.totalorder %v240_v27, 4294967294  ;;  %vm242_vm4 = vcmp.eq.s32.totalorder %v238_v28, 0  ;;  %vm245_vm5 = vcmp.ge.s32.totalorder %v241_v32, 4294967294  ;;  %vm243_vm6 = vcmp.eq.s32.totalorder %v239_v33, 0 }
  0xbc   : > { %v258_v35 = vsel %vm1888_vm1, %v255_v16, %v253_v17  ;;  %v257_v36 = vsel %vm1888_vm1, %v253_v17, %v255_v16  ;;  %vm248_vm7 = vcmp.le.s32.totalorder %v240_v27, 2  ;;  %vm246_vm8 = vmand %vm242_vm4, %vm244_vm3  ;;  %vm249_vm12 = vcmp.le.s32.totalorder %v241_v32, 2 }
  0xbd   : > { %v265_v42 = vsub.s32 %v258_v35, %v1250_v7  ;;  %v266_v43 = vsub.s32 %v257_v36, %v1258_v9  ;;  %vm1379_vm10 = vmand %vm243_vm6, %vm245_vm5  ;;  %v1946_v36 = vmov 0 }
  0xbe   : > { %vm1385_vm14 = vmand %vm246_vm8, %vm248_vm7 }
  0xbf   : > { %v262_v19 = vpop.permute.xlu1 %261  ;;  %v260_v20 = vpop.permute.xlu0 %259  ;;  %vm269_vm13 = vcmp.eq.s32.totalorder %v265_v42, 0  ;;  %v1927_v52 = vsel %vm1385_vm14, 4294967295, %v1926_v52  ;;  %vm270_vm3 = vcmp.eq.s32.totalorder %v266_v43, 0 }
  0xc0   : > { %v264_v31 = vsel %vm1888_vm1, %v262_v19, %v260_v20  ;;  %v263_v34 = vsel %vm1888_vm1, %v260_v20, %v262_v19 }
  0xc1   : > { %v267_v37 = vsub.s32 %v264_v31, %v1252_v8  ;;  %v268_v40 = vsub.s32 %v263_v34, %v1260_v10 }
  0xc3   : > { %v282_v21 = vpop.permute.xlu1 %281  ;;  %v280_v22 = vpop.permute.xlu0 %279  ;;  %vm271_vm9 = vcmp.ge.s32.totalorder %v267_v37, 4294967294  ;;  %vm272_vm11 = vcmp.ge.s32.totalorder %v268_v40, 4294967294  ;;  %vm275_vm5 = vcmp.le.s32.totalorder %v267_v37, 2  ;;  %vm276_vm7 = vcmp.le.s32.totalorder %v268_v40, 2 }
  0xc4   : > { %v284_v45 = vsel %vm1889_vm2, %v280_v22, %v282_v21  ;;  %v285_v46 = vsel %vm1889_vm2, %v282_v21, %v280_v22  ;;  %vm1390_vm4 = vmand %vm269_vm13, %vm271_vm9 }
  0xc5   : > { %v292_v54 = vsub.s32 %v284_v45, %v1250_v7  ;;  %v293_v55 = vsub.s32 %v285_v46, %v1258_v9  ;;  %vm1396_vm6 = vmand %vm270_vm3, %vm272_vm11 }
  0xc6   : > { %vm1407_vm9 = vmand %vm1379_vm10, %vm249_vm12 }
  0xc7   : > { %v289_v29 = vpop.permute.xlu1 %288  ;;  %v287_v30 = vpop.permute.xlu0 %286  ;;  %v1933_v61 = vsel %vm1407_vm9, 4294967295, %v1932_v61  ;;  %vm1423_vm10 = vmand %vm1390_vm4, %vm275_vm5  ;;  %vm296_vm12 = vcmp.eq.s32.totalorder %v292_v54, 0  ;;  %vm297_vm13 = vcmp.eq.s32.totalorder %v293_v55, 0 }
  0xc8   : > { %v290_v41 = vsel %vm1889_vm2, %v287_v30, %v289_v29  ;;  %v291_v44 = vsel %vm1889_vm2, %v289_v29, %v287_v30  ;;  %v1935_v3 = vsel %vm1423_vm10, 4294967295, %v1934_v3 }
  0xc9   : > { %v294_v47 = vsub.s32 %v290_v41, %v1252_v8  ;;  %v295_v51 = vsub.s32 %v291_v44, %v1260_v10 }
  0xcb   : > { %v448_v38 = vpop.permute.xlu1 %447  ;;  %v446_v39 = vpop.permute.xlu0 %445  ;;  %vm298_vm8 = vcmp.ge.s32.totalorder %v294_v47, 4294967294  ;;  %vm299_vm11 = vcmp.ge.s32.totalorder %v295_v51, 4294967294  ;;  %vm302_vm3 = vcmp.le.s32.totalorder %v294_v47, 2  ;;  %vm303_vm5 = vcmp.le.s32.totalorder %v295_v51, 2 }
  0xcc   : > { %v449_v57 = vsel %vm1886_vm0, %v446_v39, %v448_v38  ;;  %v450_v58 = vsel %vm1886_vm0, %v448_v38, %v446_v39  ;;  %vm1431_vm0 = vmand %vm1396_vm6, %vm276_vm7  ;;  %v1948_v39 = vmov 0 }
  0xcd   : > { %v1937_v5 = vsel %vm1431_vm0, 4294967295, %v1936_v5  ;;  %v451_v12 = vsel %vm1385_vm14, %v450_v58, -inf  ;;  %v452_v13 = vsel %vm1407_vm9, %v449_v57, -inf  ;;  %vm301_vm4 = vmand %vm297_vm13, %vm299_vm11 }
  0xce   : > { %v455_v23 = vcombine.low %v451_v12, %v452_v13  ;;  %vm1462_vm13 = vmand %vm301_vm4, %vm303_vm5 }
  0xcf   : > { %v309_v48 = vpop.permute.xlu1 %308  ;;  %v307_v49 = vpop.permute.xlu0 %306  ;;  %v1943_v26 = vsel %vm1462_vm13, 4294967295, %v1942_v26 }
  0xd0   : > { %v311_v62 = vsel %vm1887_vm15, %v307_v49, %v309_v48  ;;  %v312_v63 = vsel %vm1887_vm15, %v309_v48, %v307_v49  ;;  %v457_v33 = vmax.f32 %v1248_v6, %v455_v23 }
  0xd1   : > { %v319_v14 = vsub.s32 %v311_v62, %v1250_v7  ;;  %v320_v15 = vsub.s32 %v312_v63, %v1258_v9 }
  0xd3   : > { %v316_v59 = vpop.permute.xlu1 %315  ;;  %v314_v60 = vpop.permute.xlu0 %313  ;;  %vm323_vm11 = vcmp.eq.s32.totalorder %v319_v14, 0 }
  0xd4   : > { %v317_v0 = vsel %vm1887_vm15, %v314_v60, %v316_v59  ;;  %v318_v1 = vsel %vm1887_vm15, %v316_v59, %v314_v60  ;;  %vm1436_vm15 = vmand %vm296_vm12, %vm298_vm8  ;;  %vm324_vm12 = vcmp.eq.s32.totalorder %v320_v15, 0 }
  0xd5   : > { %v321_v2 = vsub.s32 %v317_v0, %v1252_v8  ;;  %v322_v4 = vsub.s32 %v318_v1, %v1260_v10  ;;  %vm1458_vm8 = vmand %vm1436_vm15, %vm302_vm3 }
  0xd6   : > { %v1941_v24 = vsel %vm1458_vm8, 4294967295, %v1940_v24 }
  0xd7   : > { %v461_v16 = vpop.permute.xlu1 %460  ;;  %v459_v17 = vpop.permute.xlu0 %458  ;;  %vm325_vm6 = vcmp.ge.s32.totalorder %v321_v2, 4294967294  ;;  %vm326_vm7 = vcmp.ge.s32.totalorder %v322_v4, 4294967294  ;;  %vm329_vm2 = vcmp.le.s32.totalorder %v321_v2, 2  ;;  %vm330_vm3 = vcmp.le.s32.totalorder %v322_v4, 2 }
  0xd8   : > { %v462_v19 = vsel %vm1888_vm1, %v459_v17, %v461_v16  ;;  %v463_v20 = vsel %vm1888_vm1, %v461_v16, %v459_v17  ;;  %vm327_vm1 = vmand %vm323_vm11, %vm325_vm6  ;;  %vm1898_vm6 = vcmp.lt.s32.totalorder %v1341_v18, 96 }
  0xd9   : > { %v464_v21 = vsel %vm1423_vm10, %v463_v20, -inf  ;;  %v465_v22 = vsel %vm1431_vm0, %v462_v19, -inf  ;;  %vm1944_vm0 = vcmp.lt.s32.totalorder %v1341_v18, 126  ;;  %vm328_vm15 = vmand %vm324_vm12, %vm326_vm7 }
  0xda   : > { %v468_v28 = vcombine.low %v464_v21, %v465_v22  ;;  %vm1945_vm10 = vmmov %vm1944_vm0 }
  0xdb   : > { %v474_v25 = vpop.permute.xlu1 %473  ;;  %v472_v27 = vpop.permute.xlu0 %471  ;;  %vm1475_vm4 = vmand %vm327_vm1, %vm329_vm2  ;;  %vm1895_vm1 = vcmp.lt.s32.totalorder %v1341_v18, 16  ;;  %vm1894_vm2 = vcmp.lt.s32.totalorder %v1341_v18, 32 }
  0xdc   : > { %v475_v29 = vsel %vm1944_vm0, %v472_v27, %v474_v25  ;;  %v476_v30 = vsel %vm1945_vm10, %v474_v25, %v472_v27  ;;  %v1947_v36 = vsel %vm1475_vm4, 4294967295, %v1946_v36  ;;  %v470_v38 = vmax.f32 %v457_v33, %v468_v28  ;;  %vm1479_vm0 = vmand %vm328_vm15, %vm330_vm3 }
  0xdd   : > { %v477_v31 = vsel %vm1458_vm8, %v475_v29, -inf  ;;  %v478_v32 = vsel %vm1462_vm13, %v476_v30, -inf  ;;  %v1949_v39 = vsel %vm1479_vm0, 4294967295, %v1948_v39  ;;  %vm1950_vm10 = vcmp.lt.s32.totalorder %v1341_v18, 127 }
  0xde   : > { %v481_v34 = vcombine.low %v477_v31, %v478_v32  ;;  %vm1951_vm5 = vmmov %vm1950_vm10 }
  0xdf   : > { %v487_v35 = vpop.permute.xlu1 %486  ;;  %v485_v37 = vpop.permute.xlu0 %484 }
  0xe0   : > { %v488_v40 = vsel %vm1950_vm10, %v485_v37, %v487_v35  ;;  %v489_v41 = vsel %vm1951_vm5, %v487_v35, %v485_v37  ;;  %v483_v43 = vmax.f32 %v470_v38, %v481_v34 }
  0xe1   : > { %v490_v6 = vsel %vm1475_vm4, %v488_v40, -inf  ;;  %v491_v42 = vsel %vm1479_vm0, %v489_v41, -inf  ;;  %v1957_v40 = vmov 0 }
  0xe2   : > { %v494_v44 = vcombine.low %v490_v6, %v491_v42 }
  0xe3   : > { %v334_v47 = vpop.permute.xlu0 %333  ;;  %v336_v48 = vpop.permute.xlu1 %335 }
  0xe4   : > { %v1491_v45 = vmax.f32 %v483_v43, %v494_v44  ;;  %v339_v60 = vsel %vm1895_vm1, %v336_v48, %v334_v47  ;;  %v338_v63 = vsel %vm1895_vm1, %v334_v47, %v336_v48  ;;  %v1968_v48 = vmov 0 }
  0xe5   : > { %v346_v1 = vsub.s32 %v339_v60, %v1250_v7  ;;  %v347_v13 = vsub.s32 %v338_v63, %v1258_v9 }
  0xe6   : > { %500 = vrot.lane.b32.xlu0 %v1491_v45, %s1094_s29  ;;  %v498_v46 = vcombine.high %v1491_v45, %v1491_v45 }
  0xe7   : > { %v341_v49 = vpop.permute.xlu0 %340  ;;  %v343_v50 = vpop.permute.xlu1 %342  ;;  %vm352_vm7 = vcmp.ge.s32.totalorder %v346_v1, 4294967294  ;;  %vm353_vm12 = vcmp.ge.s32.totalorder %v347_v13, 4294967294 }
  0xe8   : > { %502 = vrot.lane.b32.xlu1 %v498_v46, %s1094_s29  ;;  %v345_v62 = vsel %vm1895_vm1, %v343_v50, %v341_v49  ;;  %v344_v0 = vsel %vm1895_vm1, %v341_v49, %v343_v50 }
  0xe9   : > { %v348_v2 = vsub.s32 %v345_v62, %v1252_v8  ;;  %v349_v14 = vsub.s32 %v344_v0, %v1260_v10 }
  0xea   : > { %513 = vrot.lane.b32.xlu0 %v1491_v45, %s1095_s30 }
  0xeb   : > { %v361_v51 = vpop.permute.xlu0 %360  ;;  %v363_v53 = vpop.permute.xlu1 %362  ;;  %vm350_vm11 = vcmp.eq.s32.totalorder %v348_v2, 0  ;;  %vm351_vm15 = vcmp.eq.s32.totalorder %v349_v14, 0 }
  0xec   : > { %515 = vrot.lane.b32.xlu1 %v498_v46, %s1095_s30  ;;  %v366_v11 = vsel %vm1894_vm2, %v363_v53, %v361_v51  ;;  %v365_v15 = vsel %vm1894_vm2, %v361_v51, %v363_v53  ;;  %vm1538_vm10 = vmand %vm350_vm11, %vm352_vm7  ;;  %vm1961_vm11 = vcmp.lt.s32.totalorder %v1341_v18, 112 }
  0xed   : > { %v373_v19 = vsub.s32 %v366_v11, %v1250_v7  ;;  %v374_v21 = vsub.s32 %v365_v15, %v1258_v9  ;;  %vm1547_vm0 = vmand %vm351_vm15, %vm353_vm12  ;;  %vm1967_vm12 = vcmp.le.s32.totalorder %v347_v13, 2 }
  0xee   : > { %526 = vrot.lane.b32.xlu0 %v1491_v45, %s1096_s4  ;;  %vm1962_vm4 = vmmov %vm1961_vm11 }
  0xef   : > { %v368_v54 = vpop.permute.xlu0 %367  ;;  %v370_v55 = vpop.permute.xlu1 %369  ;;  %vm379_vm5 = vcmp.ge.s32.totalorder %v373_v19, 4294967294  ;;  %vm380_vm3 = vcmp.ge.s32.totalorder %v374_v21, 4294967294  ;;  %vm384_vm13 = vcmp.le.s32.totalorder %v374_v21, 2 }
  0xf0   : > { %528 = vrot.lane.b32.xlu1 %v498_v46, %s1096_s4  ;;  %v372_v12 = vsel %vm1894_vm2, %v370_v55, %v368_v54  ;;  %v371_v16 = vsel %vm1894_vm2, %v368_v54, %v370_v55  ;;  %v1973_v55 = vmov 0 }
  0xf1   : > { %v375_v20 = vsub.s32 %v372_v12, %v1252_v8  ;;  %v376_v22 = vsub.s32 %v371_v16, %v1260_v10 }
  0xf2   : > { %539 = vrot.lane.b32.xlu0 %v1491_v45, %s1097_s7 }
  0xf3   : > { %v388_v56 = vpop.permute.xlu0 %387  ;;  %v390_v57 = vpop.permute.xlu1 %389  ;;  %vm377_vm2 = vcmp.eq.s32.totalorder %v375_v20, 0  ;;  %vm378_vm7 = vcmp.eq.s32.totalorder %v376_v22, 0 }
  0xf4   : > { %541 = vrot.lane.b32.xlu1 %v498_v46, %s1097_s7  ;;  %v392_v23 = vsel %vm1898_vm6, %v388_v56, %v390_v57  ;;  %v393_v29 = vsel %vm1898_vm6, %v390_v57, %v388_v56  ;;  %vm1563_vm15 = vmand %vm377_vm2, %vm379_vm5 }
  0xf5   : > { %v400_v33 = vsub.s32 %v392_v23, %v1250_v7  ;;  %v401_v35 = vsub.s32 %v393_v29, %v1258_v9  ;;  %vm1571_vm8 = vmand %vm378_vm7, %vm380_vm3 }
  0xf7   : > { %v395_v58 = vpop.permute.xlu0 %394  ;;  %v397_v59 = vpop.permute.xlu1 %396  ;;  %vm406_vm2 = vcmp.ge.s32.totalorder %v400_v33, 4294967294  ;;  %vm407_vm7 = vcmp.ge.s32.totalorder %v401_v35, 4294967294 }
  0xf8   : > { %v398_v25 = vsel %vm1898_vm6, %v395_v58, %v397_v59  ;;  %v399_v30 = vsel %vm1898_vm6, %v397_v59, %v395_v58  ;;  %vm1956_vm6 = vcmp.le.s32.totalorder %v346_v1, 2  ;;  %v1975_v58 = vmov 0 }
  0xf9   : > { %v402_v34 = vsub.s32 %v398_v25, %v1252_v8  ;;  %v403_v37 = vsub.s32 %v399_v30, %v1260_v10  ;;  %vm1558_vm1 = vmand %vm1538_vm10, %vm1956_vm6 }
  0xfa   : > { %v1958_v40 = vsel %vm1558_vm1, 4294967295, %v1957_v40  ;;  %vm1965_vm6 = vmmov %vm1962_vm4 }
  0xfb   : > { %v415_v4 = vpop.permute.xlu0 %414  ;;  %v417_v17 = vpop.permute.xlu1 %416  ;;  %vm1966_vm10 = vmmov %vm1962_vm4  ;;  %vm404_vm5 = vcmp.eq.s32.totalorder %v402_v34, 0 }
  0xfc   : > { %v419_v6 = vsel %vm1961_vm11, %v415_v4, %v417_v17  ;;  %v420_v44 = vsel %vm1965_vm6, %v417_v17, %v415_v4  ;;  %vm1582_vm11 = vmand %vm1547_vm0, %vm1967_vm12  ;;  %vm405_vm6 = vcmp.eq.s32.totalorder %v403_v37, 0 }
  0xfd   : > { %v1969_v48 = vsel %vm1582_vm11, 4294967295, %v1968_v48  ;;  %v427_v51 = vsub.s32 %v419_v6, %v1250_v7  ;;  %v428_v56 = vsub.s32 %v420_v44, %v1258_v9  ;;  %vm1604_vm12 = vmand %vm1571_vm8, %vm384_vm13  ;;  %vm1979_vm8 = vcmp.lt.s32.totalorder %v1341_v18, 32 }
  0xfe   : > { %v1976_v58 = vsel %vm1604_vm12, 4294967295, %v1975_v58  ;;  %vm1980_vm13 = vmmov %vm1979_vm8 }
  0xff   : > { %v422_v27 = vpop.permute.xlu0 %421  ;;  %v424_v31 = vpop.permute.xlu1 %423  ;;  %vm438_vm9 = vcmp.le.s32.totalorder %v428_v56, 2 }
 0x100   : > { %v425_v42 = vsel %vm1962_vm4, %v422_v27, %v424_v31  ;;  %v426_v46 = vsel %vm1966_vm10, %v424_v31, %v422_v27  ;;  %vm1970_vm4 = vcmp.lt.s32.totalorder %v1341_v18, 16  ;;  %vm1972_vm10 = vcmp.le.s32.totalorder %v373_v19, 2 }
 0x101   : > { %vm1971_vm3 = vmmov %vm1970_vm4  ;;  %v429_v53 = vsub.s32 %v425_v42, %v1252_v8  ;;  %v430_v57 = vsub.s32 %v426_v46, %v1260_v10 }
 0x102   : > { %vm1595_vm0 = vmand %vm1563_vm15, %vm1972_vm10  ;;  %vm411_vm15 = vcmp.le.s32.totalorder %v401_v35, 2 }
 0x103   : > { %v1974_v55 = vsel %vm1595_vm0, 4294967295, %v1973_v55  ;;  %vm409_vm10 = vmand %vm405_vm6, %vm407_vm7 }
 0x104   : > { %vm1633_vm6 = vmand %vm409_vm10, %vm411_vm15  ;;  %vm1998_vm15 = vcmp.lt.s32.totalorder %v1341_v18, 2 }
 0x105   : > { %vm1999_vm10 = vmmov %vm1998_vm15 }
 0x158   : > { %v501_v38 = vpop.permute.xlu0 %500 }
 0x15a   : > { %v503_v47 = vpop.permute.xlu1 %502 }
 0x15b   : > { %v504_v49 = vsel %vm1970_vm4, %v501_v38, %v503_v47  ;;  %v505_v50 = vsel %vm1971_vm3, %v503_v47, %v501_v38  ;;  %vm1609_vm3 = vmand %vm404_vm5, %vm406_vm2  ;;  %vm433_vm2 = vcmp.ge.s32.totalorder %v427_v51, 4294967294  ;;  %vm431_vm5 = vcmp.eq.s32.totalorder %v429_v53, 0 }
 0x15c   : > { %v514_v54 = vpop.permute.xlu0 %513  ;;  %v506_v8 = vsel %vm1558_vm1, %v505_v50, -inf  ;;  %v507_v9 = vsel %vm1582_vm11, %v504_v49, -inf  ;;  %vm434_vm4 = vcmp.ge.s32.totalorder %v428_v56, 4294967294  ;;  %vm432_vm11 = vcmp.eq.s32.totalorder %v430_v57, 0 }
 0x15d   : > { %v510_v1 = vcombine.low %v506_v8, %v507_v9  ;;  %vm1981_vm1 = vcmp.le.s32.totalorder %v400_v33, 2  ;;  %vm436_vm14 = vmand %vm432_vm11, %vm434_vm4  ;;  %vm1992_vm11 = vcmp.lt.s32.totalorder %v1341_v18, 112  ;;  %vm1996_vm4 = vnez %v1927_v52 }
 0x15e   : > { %v516_v10 = vpop.permute.xlu1 %515  ;;  %vm1629_vm7 = vmand %vm1609_vm3, %vm1981_vm1  ;;  %vm1997_vm3 = vnez %v1933_v61 }
 0x15f   : > { %v517_v59 = vsel %vm1979_vm8, %v514_v54, %v516_v10  ;;  %v518_v60 = vsel %vm1980_vm13, %v516_v10, %v514_v54  ;;  %vm437_vm8 = vcmp.le.s32.totalorder %v427_v51, 2  ;;  %vm435_vm13 = vmand %vm431_vm5, %vm433_vm2  ;;  %v512_v17 = vmax.f32 %v1491_v45, %v510_v1 }
 0x160   : > { %v519_v62 = vsel %vm1595_vm0, %v518_v60, -inf  ;;  %v520_v63 = vsel %vm1604_vm12, %v517_v59, -inf  ;;  %v527_v0 = vpop.permute.xlu0 %526  ;;  %vm1986_vm12 = vcmp.lt.s32.totalorder %v1341_v18, 96  ;;  %vm1646_vm1 = vmand %vm435_vm13, %vm437_vm8  ;;  %vm2000_vm2 = vnez %v1935_v3 }
 0x161   : > { %v523_v12 = vcombine.low %v519_v62, %v520_v63  ;;  %vm1987_vm0 = vmmov %vm1986_vm12  ;;  %vm2001_vm5 = vnez %v1937_v5  ;;  %vm2002_vm8 = vcmp.lt.s32.totalorder %v1341_v18, 126 }
 0x162   : > { %v529_v4 = vpop.permute.xlu1 %528  ;;  %vm2003_vm13 = vmmov %vm2002_vm8 }
 0x163   : > { %v530_v13 = vsel %vm1986_vm12, %v527_v0, %v529_v4  ;;  %v531_v14 = vsel %vm1987_vm0, %v529_v4, %v527_v0  ;;  %v525_v23 = vmax.f32 %v512_v17, %v523_v12  ;;  %vm1650_vm0 = vmand %vm436_vm14, %vm438_vm9  ;;  %vm1994_vm14 = vcmp.lt.s32.totalorder %v1341_v18, 1 }
 0x164   : > { %v532_v15 = vsel %vm1629_vm7, %v530_v13, -inf  ;;  %v533_v16 = vsel %vm1633_vm6, %v531_v14, -inf  ;;  %v540_v20 = vpop.permute.xlu0 %539  ;;  %vm1993_vm12 = vmmov %vm1992_vm11 }
 0x165   : > { %v536_v19 = vcombine.low %v532_v15, %v533_v16  ;;  %vm1995_vm9 = vmmov %vm1994_vm14 }
 0x166   : > { %v542_v21 = vpop.permute.xlu1 %541 }
 0x167   : > { %v543_v27 = vsel %vm1992_vm11, %v540_v20, %v542_v21  ;;  %v544_v28 = vsel %vm1993_vm12, %v542_v21, %v540_v20  ;;  %v538_v30 = vmax.f32 %v525_v23, %v536_v19  ;;  %vm2004_vm11 = vnez %v1941_v24 }
 0x168   : > { %v545_v45 = vsel %vm1646_vm1, %v543_v27, -inf  ;;  %v546_v29 = vsel %vm1650_vm0, %v544_v28, -inf  ;;  %vm2005_vm12 = vnez %v1943_v26 }
 0x169   : > { %v549_v31 = vcombine.low %v545_v45, %v546_v29 }
 0x16b   : > { %v551_v32 = vmax.f32 %v538_v30, %v549_v31 }
 0x16d   : > { %892 = vst [vmem:[%s1254_s24 + $0x8] sm:$0xff] %v551_v32  ;;  %555 = vrot.lane.b32.xlu0 %v551_v32, %s1090_s21  ;;  %v553_v33 = vcombine.high %v551_v32, %v551_v32 }
 0x16f   : > { %557 = vrot.lane.b32.xlu1 %v553_v33, %s1090_s21 }
 0x171   : > { %568 = vrot.lane.b32.xlu0 %v551_v32, %s1091_s22 }
 0x173   : > { %570 = vrot.lane.b32.xlu1 %v553_v33, %s1091_s22 }
 0x175   : > { %581 = vrot.lane.b32.xlu0 %v551_v32, %s1092_s23 }
 0x177   : > { %583 = vrot.lane.b32.xlu1 %v553_v33, %s1092_s23 }
 0x179   : > { %594 = vrot.lane.b32.xlu0 %v551_v32, %s1093_s28 }
 0x17b   : > { %596 = vrot.lane.b32.xlu1 %v553_v33, %s1093_s28 }
 0x1df   : > { %v556_v34 = vpop.permute.xlu0 %555 }
 0x1e1   : > { %v558_v35 = vpop.permute.xlu1 %557 }
 0x1e2   : > { %v559_v37 = vsel %vm1994_vm14, %v556_v34, %v558_v35  ;;  %v560_v38 = vsel %vm1995_vm9, %v558_v35, %v556_v34  ;;  %vm2006_vm14 = vcmp.lt.s32.totalorder %v1341_v18, 127 }
 0x1e3   : > { %v569_v41 = vpop.permute.xlu0 %568  ;;  %v561_v6 = vsel %vm1996_vm4, %v560_v38, -inf  ;;  %v562_v42 = vsel %vm1997_vm3, %v559_v37, -inf  ;;  %vm2007_vm9 = vmmov %vm2006_vm14 }
 0x1e4   : > { %v565_v51 = vcombine.low %v561_v6, %v562_v42 }
 0x1e5   : > { %v571_v43 = vpop.permute.xlu1 %570 }
 0x1e6   : > { %v572_v44 = vsel %vm1998_vm15, %v569_v41, %v571_v43  ;;  %v573_v46 = vsel %vm1999_vm10, %v571_v43, %v569_v41  ;;  %v567_v9 = vmax.f32 %v551_v32, %v565_v51  ;;  %vm2008_vm15 = vnez %v1947_v36 }
 0x1e7   : > { %v574_v47 = vsel %vm2000_vm2, %v573_v46, -inf  ;;  %v575_v49 = vsel %vm2001_vm5, %v572_v44, -inf  ;;  %v582_v50 = vpop.permute.xlu0 %581  ;;  %vm2009_vm10 = vnez %v1949_v39 }
 0x1e8   : > { %v578_v54 = vcombine.low %v574_v47, %v575_v49 }
 0x1e9   : > { %v584_v53 = vpop.permute.xlu1 %583 }
 0x1ea   : > { %v585_v56 = vsel %vm2002_vm8, %v582_v50, %v584_v53  ;;  %v586_v57 = vsel %vm2003_vm13, %v584_v53, %v582_v50  ;;  %v580_v62 = vmax.f32 %v567_v9, %v578_v54  ;;  %vm2010_vm8 = vcmp.lt.s32.totalorder %v1341_v18, 16 }
 0x1eb   : > { %v587_v7 = vsel %vm2004_vm11, %v585_v56, -inf  ;;  %v588_v8 = vsel %vm2005_vm12, %v586_v57, -inf  ;;  %v595_v59 = vpop.permute.xlu0 %594  ;;  %vm2011_vm13 = vmmov %vm2010_vm8  ;;  %vm2016_vm12 = vnez %v1974_v55 }
 0x1ec   : > { %v591_v10 = vcombine.low %v587_v7, %v588_v8 }
 0x1ed   : > { %v597_v60 = vpop.permute.xlu1 %596 }
 0x1ee   : > { %v598_v63 = vsel %vm2006_vm14, %v595_v59, %v597_v60  ;;  %v599_v0 = vsel %vm2007_vm9, %v597_v60, %v595_v59  ;;  %v593_v12 = vmax.f32 %v580_v62, %v591_v10  ;;  %vm2012_vm14 = vnez %v1958_v40 }
 0x1ef   : > { %v600_v1 = vsel %vm2008_vm15, %v598_v63, -inf  ;;  %v601_v4 = vsel %vm2009_vm10, %v599_v0, -inf  ;;  %vm2013_vm9 = vnez %v1969_v48  ;;  %vm2014_vm10 = vcmp.lt.s32.totalorder %v1341_v18, 32 }
 0x1f0   : > { %v604_v13 = vcombine.low %v600_v1, %v601_v4  ;;  %vm2015_vm15 = vmmov %vm2014_vm10 }
 0x1f2   : > { %v606_v14 = vmax.f32 %v593_v12, %v604_v13 }
 0x1f4   : > { %610 = vrot.lane.b32.xlu0 %v606_v14, %s1094_s29  ;;  %v608_v15 = vcombine.high %v606_v14, %v606_v14 }
 0x1f6   : > { %612 = vrot.lane.b32.xlu1 %v608_v15, %s1094_s29 }
 0x1f8   : > { %623 = vrot.lane.b32.xlu0 %v606_v14, %s1095_s30 }
 0x1fa   : > { %625 = vrot.lane.b32.xlu1 %v608_v15, %s1095_s30 }
 0x1fc   : > { %636 = vrot.lane.b32.xlu0 %v606_v14, %s1096_s4 }
 0x1fe   : > { %638 = vrot.lane.b32.xlu1 %v608_v15, %s1096_s4 }
 0x200   : > { %649 = vrot.lane.b32.xlu0 %v606_v14, %s1097_s7 }
 0x202   : > { %651 = vrot.lane.b32.xlu1 %v608_v15, %s1097_s7 }
 0x266   : > { %v611_v16 = vpop.permute.xlu0 %610 }
 0x268   : > { %v613_v17 = vpop.permute.xlu1 %612 }
 0x269   : > { %v614_v19 = vsel %vm2010_vm8, %v611_v16, %v613_v17  ;;  %v615_v20 = vsel %vm2011_vm13, %v613_v17, %v611_v16  ;;  %vm2017_vm8 = vnez %v1976_v58  ;;  %vm2018_vm13 = vcmp.lt.s32.totalorder %v1341_v18, 96 }
 0x26a   : > { %v624_v21 = vpop.permute.xlu0 %623  ;;  %v616_v23 = vsel %vm2012_vm14, %v615_v20, -inf  ;;  %v617_v27 = vsel %vm2013_vm9, %v614_v19, -inf  ;;  %vm2019_vm9 = vmmov %vm2018_vm13 }
 0x26b   : > { %v620_v33 = vcombine.low %v616_v23, %v617_v27 }
 0x26c   : > { %v626_v28 = vpop.permute.xlu1 %625 }
 0x26d   : > { %v627_v45 = vsel %vm2014_vm10, %v624_v21, %v626_v28  ;;  %v628_v29 = vsel %vm2015_vm15, %v626_v28, %v624_v21  ;;  %v622_v42 = vmax.f32 %v606_v14, %v620_v33  ;;  %vm2020_vm15 = vcmp.lt.s32.totalorder %v1341_v18, 112 }
 0x26e   : > { %v629_v30 = vsel %vm2016_vm12, %v628_v29, -inf  ;;  %v630_v31 = vsel %vm2017_vm8, %v627_v45, -inf  ;;  %v637_v32 = vpop.permute.xlu0 %636  ;;  %vm2021_vm10 = vmmov %vm2020_vm15 }
 0x26f   : > { %v633_v35 = vcombine.low %v629_v30, %v630_v31 }
 0x270   : > { %v639_v34 = vpop.permute.xlu1 %638 }
 0x271   : > { %v640_v37 = vsel %vm2018_vm13, %v637_v32, %v639_v34  ;;  %v641_v38 = vsel %vm2019_vm9, %v639_v34, %v637_v32  ;;  %v635_v47 = vmax.f32 %v622_v42, %v633_v35  ;;  %vm2022_vm9 = vcmp.lt.s32.totalorder %v1341_v18, 1 }
 0x272   : > { %v642_v41 = vsel %vm1629_vm7, %v640_v37, -inf  ;;  %v643_v6 = vsel %vm1633_vm6, %v641_v38, -inf  ;;  %v650_v44 = vpop.permute.xlu0 %649  ;;  %vm2023_vm13 = vmmov %vm2022_vm9 }
 0x273   : > { %v646_v43 = vcombine.low %v642_v41, %v643_v6 }
 0x274   : > { %v652_v46 = vpop.permute.xlu1 %651 }
 0x275   : > { %v653_v49 = vsel %vm2020_vm15, %v650_v44, %v652_v46  ;;  %v654_v50 = vsel %vm2021_vm10, %v652_v46, %v650_v44  ;;  %v648_v54 = vmax.f32 %v635_v47, %v646_v43  ;;  %vm2024_vm15 = vcmp.lt.s32.totalorder %v1341_v18, 2 }
 0x276   : > { %v655_v51 = vsel %vm1646_vm1, %v653_v49, -inf  ;;  %v656_v53 = vsel %vm1650_vm0, %v654_v50, -inf  ;;  %vm2025_vm10 = vmmov %vm2024_vm15 }
 0x277   : > { %v659_v56 = vcombine.low %v655_v51, %v656_v53 }
 0x279   : > { %v661_v57 = vmax.f32 %v648_v54, %v659_v56 }
 0x27b   : > { %893 = vst [vmem:[%s1254_s24 + $0x10] sm:$0xff] %v661_v57  ;;  %665 = vrot.lane.b32.xlu0 %v661_v57, %s1090_s21  ;;  %v663_v7 = vcombine.high %v661_v57, %v661_v57 }
 0x27d   : > { %667 = vrot.lane.b32.xlu1 %v663_v7, %s1090_s21  ;;  %s1009_s21 = sshll.u32 %s1098_s19, 4  ;;  %s1010_s21 = int_to_ptr.vmem [resolvable:$false] %s1009_s21 }
 0x27e   : > { %p1012_p7 = scmp.lt.s32.totalorder %s1831_s18, %s1010_s21 }
 0x27f   : > { %678 = vrot.lane.b32.xlu0 %v661_v57, %s1091_s22 }
 0x281   : > { %680 = vrot.lane.b32.xlu1 %v663_v7, %s1091_s22  ;;  %s1011_s22 = scalar_lea.vmem %s1010_s21, 1024 }
 0x282   : > { %p1013_p13 = scmp.lt.s32.totalorder %s1011_s22, %s1005_s10 }
 0x283   : > { %691 = vrot.lane.b32.xlu0 %v661_v57, %s1092_s23 }
 0x284   : > { %p1014_p3 = por %p1013_p13, %p1012_p7 }
 0x285   : > { %693 = vrot.lane.b32.xlu1 %v663_v7, %s1092_s23 }
 0x286   : > { %p1015_p6 = pnand %p1014_p3, %p1008_p0 }
 0x287   : > { %704 = vrot.lane.b32.xlu0 %v661_v57, %s1093_s28 }
 0x289   : > { %706 = vrot.lane.b32.xlu1 %v663_v7, %s1093_s28 }
 0x2ed   : > { %v666_v8 = vpop.permute.xlu0 %665 }
 0x2ef   : > { %v668_v9 = vpop.permute.xlu1 %667 }
 0x2f0   : > { %v669_v10 = vsel %vm2022_vm9, %v666_v8, %v668_v9  ;;  %v670_v59 = vsel %vm2023_vm13, %v668_v9, %v666_v8  ;;  %vm2028_vm9 = vnez %v1943_v26  ;;  %vm2031_vm13 = vnez %v1947_v36 }
 0x2f1   : > { %v679_v60 = vpop.permute.xlu0 %678  ;;  %v671_v62 = vsel %vm1996_vm4, %v670_v59, -inf  ;;  %v672_v63 = vsel %vm1997_vm3, %v669_v10, -inf  ;;  %vm2026_vm4 = vcmp.lt.s32.totalorder %v1341_v18, 126 }
 0x2f2   : > { %v675_v15 = vcombine.low %v671_v62, %v672_v63  ;;  %vm2027_vm3 = vmmov %vm2026_vm4 }
 0x2f3   : > { %v681_v0 = vpop.permute.xlu1 %680 }
 0x2f4   : > { %v682_v1 = vsel %vm2024_vm15, %v679_v60, %v681_v0  ;;  %v683_v4 = vsel %vm2025_vm10, %v681_v0, %v679_v60  ;;  %v677_v20 = vmax.f32 %v661_v57, %v675_v15  ;;  %vm2032_vm15 = vnez %v1949_v39 }
 0x2f5   : > { %v684_v12 = vsel %vm2000_vm2, %v683_v4, -inf  ;;  %v685_v13 = vsel %vm2001_vm5, %v682_v1, -inf  ;;  %v692_v14 = vpop.permute.xlu0 %691  ;;  %vm2029_vm2 = vcmp.lt.s32.totalorder %v1341_v18, 127 }
 0x2f6   : > { %v688_v16 = vcombine.low %v684_v12, %v685_v13  ;;  %vm2030_vm5 = vmmov %vm2029_vm2 }
 0x2f7   : > { %v694_v52 = vpop.permute.xlu1 %693 }
 0x2f8   : > { %v695_v61 = vsel %vm2026_vm4, %v692_v14, %v694_v52  ;;  %v696_v17 = vsel %vm2027_vm3, %v694_v52, %v692_v14  ;;  %v690_v27 = vmax.f32 %v677_v20, %v688_v16  ;;  %vm2035_vm4 = vnez %v1969_v48 }
 0x2f9   : > { %v697_v19 = vsel %vm2004_vm11, %v695_v61, -inf  ;;  %v698_v3 = vsel %vm2028_vm9, %v696_v17, -inf  ;;  %v705_v5 = vpop.permute.xlu0 %704  ;;  %vm2033_vm11 = vcmp.lt.s32.totalorder %v1341_v18, 16  ;;  %vm2036_vm3 = vcmp.lt.s32.totalorder %v1341_v18, 32 }
 0x2fa   : > { %v701_v21 = vcombine.low %v697_v19, %v698_v3  ;;  %vm2034_vm10 = vmmov %vm2033_vm11 }
 0x2fb   : > { %v707_v23 = vpop.permute.xlu1 %706  ;;  %vm2037_vm9 = vmmov %vm2036_vm3 }
 0x2fc   : > { %v708_v28 = vsel %vm2029_vm2, %v705_v5, %v707_v23  ;;  %v709_v45 = vsel %vm2030_vm5, %v707_v23, %v705_v5  ;;  %v703_v30 = vmax.f32 %v690_v27, %v701_v21 }
 0x2fd   : > { %v710_v29 = vsel %vm2031_vm13, %v708_v28, -inf  ;;  %v711_v24 = vsel %vm2032_vm15, %v709_v45, -inf }
 0x2fe   : > { %v714_v26 = vcombine.low %v710_v29, %v711_v24 }
 0x300   : > { %v716_v31 = vmax.f32 %v703_v30, %v714_v26 }
 0x302   : > { %720 = vrot.lane.b32.xlu0 %v716_v31, %s1094_s29  ;;  %v718_v32 = vcombine.high %v716_v31, %v716_v31 }
 0x304   : > { %722 = vrot.lane.b32.xlu1 %v718_v32, %s1094_s29 }
 0x306   : > { %733 = vrot.lane.b32.xlu0 %v716_v31, %s1095_s30 }
 0x308   : > { %735 = vrot.lane.b32.xlu1 %v718_v32, %s1095_s30 }
 0x30a   : > { %746 = vrot.lane.b32.xlu0 %v716_v31, %s1096_s4 }
 0x30c   : > { %748 = vrot.lane.b32.xlu1 %v718_v32, %s1096_s4 }
 0x30e   : > { %759 = vrot.lane.b32.xlu0 %v716_v31, %s1097_s7 }
 0x310   : > { %761 = vrot.lane.b32.xlu1 %v718_v32, %s1097_s7 }
 0x374   : > { %v721_v36 = vpop.permute.xlu0 %720 }
 0x376   : > { %v723_v39 = vpop.permute.xlu1 %722 }
 0x377   : > { %v724_v33 = vsel %vm2033_vm11, %v721_v36, %v723_v39  ;;  %v725_v34 = vsel %vm2034_vm10, %v723_v39, %v721_v36 }
 0x378   : > { %v734_v35 = vpop.permute.xlu0 %733  ;;  %v726_v37 = vsel %vm2012_vm14, %v725_v34, -inf  ;;  %v727_v38 = vsel %vm2035_vm4, %v724_v33, -inf  ;;  %vm2038_vm14 = vcmp.lt.s32.totalorder %v1341_v18, 96 }
 0x379   : > { %v730_v40 = vcombine.low %v726_v37, %v727_v38  ;;  %vm2039_vm2 = vmmov %vm2038_vm14 }
 0x37a   : > { %v736_v41 = vpop.permute.xlu1 %735 }
 0x37b   : > { %v737_v6 = vsel %vm2036_vm3, %v734_v35, %v736_v41  ;;  %v738_v42 = vsel %vm2037_vm9, %v736_v41, %v734_v35  ;;  %v732_v58 = vmax.f32 %v716_v31, %v730_v40 }
 0x37c   : > { %v739_v43 = vsel %vm2016_vm12, %v738_v42, -inf  ;;  %v740_v44 = vsel %vm2017_vm8, %v737_v6, -inf  ;;  %v747_v46 = vpop.permute.xlu0 %746  ;;  %vm2040_vm12 = vcmp.lt.s32.totalorder %v1341_v18, 112 }
 0x37d   : > { %v743_v48 = vcombine.low %v739_v43, %v740_v44  ;;  %vm2041_vm8 = vmmov %vm2040_vm12 }
 0x37e   : > { %v749_v47 = vpop.permute.xlu1 %748 }
 0x37f   : > { %v750_v49 = vsel %vm2038_vm14, %v747_v46, %v749_v47  ;;  %v751_v50 = vsel %vm2039_vm2, %v749_v47, %v747_v46  ;;  %v745_v57 = vmax.f32 %v732_v58, %v743_v48 }
 0x380   : > { %v752_v51 = vsel %vm1629_vm7, %v750_v49, -inf  ;;  %v753_v55 = vsel %vm1633_vm6, %v751_v50, -inf  ;;  %v760_v54 = vpop.permute.xlu0 %759 }
 0x381   : > { %v756_v53 = vcombine.low %v752_v51, %v753_v55 }
 0x382   : > { %v762_v56 = vpop.permute.xlu1 %761 }
 0x383   : > { %v763_v7 = vsel %vm2040_vm12, %v760_v54, %v762_v56  ;;  %v764_v8 = vsel %vm2041_vm8, %v762_v56, %v760_v54  ;;  %v758_v9 = vmax.f32 %v745_v57, %v756_v53 }
 0x384   : > { %v765_v2 = vsel %vm1646_vm1, %v763_v7, -inf  ;;  %v766_v11 = vsel %vm1650_vm0, %v764_v8, -inf }
 0x385   : > { %v769_v10 = vcombine.low %v765_v2, %v766_v11 }
 0x387   : > { %v771_v18 = vmax.f32 %v758_v9, %v769_v10 }
 0x389   : > { %894 = vst [vmem:[%s1254_s24 + $0x18] sm:$0xff] %v771_v18 }
 0x38a   : > { %1018 = shalt.err (!%p1015_p6)
}
 0x38b   : > { %s1019_s24 = scalar_lea.hbm %s1829_s9, 512  ;;  %s1023_s29 = scalar_lea.hbm %s1884_s3, 1024 }
 0x38c   : > { %p1020_p4 = scmp.ne.s32.totalorder %s1829_s9, %s1019_s24  ;;  %p1024_p1 = scmp.lt.u32.totalorder %s1829_s9, %s1884_s3 }
 0x38d   : > { %p1025_p2 = scmp.lt.u32.totalorder %s1023_s29, %s1019_s24  ;;  %p1027_p8 = scmp.lt.u32.totalorder %s1019_s24, %s1829_s9 }
 0x38e   : > { %p1021_p10 = pnand %p1020_p4, %p2042_p9 }
 0x38f   : > { %p1026_p5 = por %p1025_p2, %p1024_p1 }
 0x390   : > { %p1022_p12 = pneg %p1021_p10 }
 0x391   : > { %p1028_p11 = por %p1027_p8, %p1026_p5 }
 0x393   : > { %p1029_p0 = pnand %p1028_p11, %p1022_p12 }
 0x395   : > { %1032 = shalt.err (!%p1029_p0)
}
 0x396   : > { %s1099_s7 = smov 128   ;;  %s1100_s11 = smov 8  }
 0x397   : > { %904 = dma.vmem_to_hbm [thread:$0]  (%p2042_p9), %s1831_s18, 512, %s1829_s9, %s780_s15, %s1099_s7, %s1099_s7, %s1100_s11  }
 0x398 PF: > { %s810_s6 = sand.u32 1, %s1067_s12   ;;  %p2043_p7 = scmp.ne.s32.totalorder %s1920_s27, 0 }
 0x399   : > { %p2044_p13 = scmp.ge.s32.totalorder %s1087_s17, 2  ;;  %s811_s8 = scalar_lea.sflag [#allocation4], %s810_s6 }
 0x39b   : > { %p911_p3 = pnand %p2044_p13, %p2043_p7 }
 0x39d   : > { %1062 = dma.done.wait (!%p911_p3), %s811_s8, 512  }
 0x39e   : > { %1064 = vsyncadd (!%p911_p3), %s811_s8, 4294966784  ;;  %s19_s17 = sadd.s32 1, %s1087_s17   ;;  %s2045_s12 = smov %s1071_s13 }
 0x39f   : > { %p16_p6 = scmp.ge.s32.totalorder %s19_s17, 4   ;;  %s2046_s13 = smov %s1075_s14 }
 0x3a0   : > { %s2047_s14 = smov %s1177_s26  ;;  %s2048_s15 = smov %s1083_s16 }
 0x3a1   : > { %s2049_s16 = smov %s2051_s20  ;;  %18 = sbr.rel (!%p16_p6) target bundleno = 6 (0x6), region = 80 }
 0x3a8   :  { %816 = vsyncpa [#allocation3], 1 }
 0x3a9   :  { %818 = vsyncpa [#allocation3 + $0x1], 1 }
 0x3aa   :  { %819 = vsyncpa [#allocation4], 1 }
 0x3ab   :  { %821 = vsyncpa [#allocation4 + $0x1], 1 }

</bundles_post_ra>
